<compile_context>
chip_gen: v5e
topology: v5e:2x2
jax: 0.10.0
libtpu: 0.0.40
codegen_flags: <defaults>
</compile_context>

<pallas_src>
import functools

import jax
import jax.numpy as jnp
from jax import lax
from jax.experimental import pallas as pl
from jax.experimental.pallas import tpu as pltpu


def _loss_kernel(target_ref, pred_ref, trans_ref, out_ref, *, scale, B, C, D):
    # ---- NLL term: mean_b ( -pred[b, target[b]] ) --------------------------
    # target_ref is an SMEM (B,) int32 ref (scalar prefetch).  Select the target class of
    # each row with a lane-iota mask and accumulate the masked rows; one reduce at the end.
    col = lax.broadcasted_iota(jnp.int32, (1, C), 1)

    def nll_body(b, acc):
        tgt_b = target_ref[b]                              # scalar int32 from SMEM
        row = pred_ref[pl.ds(b, 1), :]                     # (1, C) f32 log-probs
        return acc + jnp.where(col == tgt_b, row, jnp.float32(0.0))

    picked = lax.fori_loop(0, B, nll_body, jnp.zeros((1, C), jnp.float32), unroll=True)
    nll = -jnp.sum(picked) * jnp.float32(1.0 / B)

    # ---- feature-transform regularizer: mean_b || T_b T_b^T - I ||_F -------
    # Hoisted identity mask (built once, reused by every unrolled iteration).
    row_i = lax.broadcasted_iota(jnp.int32, (D, D), 0)
    col_i = lax.broadcasted_iota(jnp.int32, (D, D), 1)
    eye = jnp.where(row_i == col_i, jnp.float32(1.0), jnp.float32(0.0))

    def reg_body(b, acc):
        tb = trans_ref[b].astype(jnp.bfloat16)             # (D, D) bf16 for the MXU
        # T_b @ T_b^T: contract the last axis of both operands (no XLU transpose),
        # accumulate in f32 on the MXU.
        m = lax.dot_general(
            tb, tb, (((1,), (1,)), ((), ())),
            preferred_element_type=jnp.float32,
        )                                                   # (D, D) f32
        diff = m - eye                                      # subtract I on the diagonal
        fro2 = jnp.sum(diff * diff)                         # ||T_b T_b^T - I||_F^2
        return acc + jnp.sqrt(fro2)

    reg_sum = lax.fori_loop(0, B, reg_body, jnp.float32(0.0), unroll=True)
    mat_diff = reg_sum * jnp.float32(1.0 / B)

    # ---- combine and write the scalar (SMEM output, scalar path) -----------
    out_ref[0] = nll + mat_diff * jnp.float32(scale)


def get_loss_pallas(pred, target, trans_feat, mat_diff_loss_scale=0.001):
    """pred: (B, C) f32 log-probs; target: (B,) int; trans_feat: (B, D, D) f32."""
    B, C = pred.shape
    _, D, _ = trans_feat.shape
    target_i32 = target.astype(jnp.int32)

    kernel = functools.partial(
        _loss_kernel, scale=float(mat_diff_loss_scale), B=B, C=C, D=D
    )

    out = pl.pallas_call(
        kernel,
        out_shape=jax.ShapeDtypeStruct((1,), jnp.float32),
        grid_spec=pltpu.PrefetchScalarGridSpec(
            num_scalar_prefetch=1,                          # target -> SMEM
            grid=(1,),                                      # single resident step
            in_specs=[
                pl.BlockSpec((B, C), lambda i, tgt: (0, 0)),        # full pred block
                pl.BlockSpec((B, D, D), lambda i, tgt: (0, 0, 0)),  # all transform matrices
            ],
            out_specs=pl.BlockSpec(memory_space=pltpu.MemorySpace.SMEM),
        ),
    )(target_i32, pred, trans_feat)
    return out[0]


def get_loss_ref(pred, target, trans_feat, mat_diff_loss_scale=0.001):
    """Plain-JAX reference mirroring the PyTorch module."""
    B = pred.shape[0]
    nll = -jnp.mean(pred[jnp.arange(B), target])
    D = trans_feat.shape[1]
    eye = jnp.eye(D, dtype=jnp.float32)[None]
    mm = jnp.einsum("bij,bkj->bik", trans_feat, trans_feat) - eye
    mat_diff = jnp.mean(jnp.sqrt(jnp.sum(mm * mm, axis=(1, 2))))
    return nll + mat_diff * mat_diff_loss_scale


if __name__ == "__main__":
    key = jax.random.PRNGKey(0)
    k1, k2, k3 = jax.random.split(key, 3)

    B, C, D = 8, 16, 64   # batch, num classes, feature-transform dim (PointNet uses D=64)

    logits = jax.random.normal(k1, (B, C), dtype=jnp.float32)
    pred = jax.nn.log_softmax(logits, axis=-1)               # log-probs, as nll_loss expects
    target = jax.random.randint(k2, (B,), 0, C, dtype=jnp.int32)
    trans_feat = jax.random.normal(k3, (B, D, D), dtype=jnp.float32) * 0.1

    total_loss = get_loss_pallas(pred, target, trans_feat, mat_diff_loss_scale=0.001)
    total_loss = jax.block_until_ready(total_loss)

    ref = get_loss_ref(pred, target, trans_feat, mat_diff_loss_scale=0.001)
    assert jnp.allclose(total_loss, ref, rtol=1e-4, atol=1e-4), (total_loss, ref)

    print("KERNEL_OK")
</pallas_src>

<mosaic_0001>
module attributes {stable_mosaic.version = 11 : i64} {
  func.func @_loss_kernel(%arg0: i32, %arg1: memref<8xi32, #tpu.memory_space<smem>>, %arg2: memref<8x16xf32, #tpu.memory_space<vmem>>, %arg3: memref<8x64x64xf32, #tpu.memory_space<vmem>>, %arg4: memref<1xf32, #tpu.memory_space<smem>>) attributes {dimension_semantics = [#tpu.dimension_semantics<arbitrary>], iteration_bounds = array<i64: 1>, scalar_prefetch = 1 : i64, scratch_operands = 0 : i64, tpu.core_type = #tpu.core_type<tc>, window_params = [{pipeline_mode = #tpu.pipeline_mode<synchronous>, transform_indices = @transform_0, window_bounds = array<i64: 8, 16>}, {pipeline_mode = #tpu.pipeline_mode<synchronous>, transform_indices = @transform_1, window_bounds = array<i64: 8, 64, 64>}, {transform_indices = @transform_2, window_bounds = array<i64: 1>}]} {
    %0 = tpu.iota {dimensions = array<i32: 1>} : vector<1x16xi32>
    %cst = arith.constant 0.000000e+00 : f32
    %1 = vector.broadcast %cst : f32 to vector<1x16xf32>
    %c0_i32 = arith.constant 0 : i32
    %2 = arith.index_cast %c0_i32 : i32 to index
    %3 = memref.load %arg1[%2] : memref<8xi32, #tpu.memory_space<smem>>
    %4 = arith.index_cast %c0_i32 : i32 to index
    %c0 = arith.constant 0 : index
    %5 = vector.load %arg2[%4, %c0] : memref<8x16xf32, #tpu.memory_space<vmem>>, vector<1x16xf32>
    %6 = vector.broadcast %3 : i32 to vector<1x16xi32>
    %7 = arith.cmpi eq, %0, %6 : vector<1x16xi32>
    %cst_0 = arith.constant 0.000000e+00 : f32
    %8 = vector.broadcast %cst_0 : f32 to vector<1x16xf32>
    %9 = arith.select %7, %5, %8 : vector<1x16xi1>, vector<1x16xf32>
    %10 = arith.addf %1, %9 : vector<1x16xf32>
    %c1_i32 = arith.constant 1 : i32
    %11 = arith.index_cast %c1_i32 : i32 to index
    %12 = memref.load %arg1[%11] : memref<8xi32, #tpu.memory_space<smem>>
    %13 = arith.index_cast %c1_i32 : i32 to index
    %c0_1 = arith.constant 0 : index
    %14 = vector.load %arg2[%13, %c0_1] : memref<8x16xf32, #tpu.memory_space<vmem>>, vector<1x16xf32>
    %15 = vector.broadcast %12 : i32 to vector<1x16xi32>
    %16 = arith.cmpi eq, %0, %15 : vector<1x16xi32>
    %cst_2 = arith.constant 0.000000e+00 : f32
    %17 = vector.broadcast %cst_2 : f32 to vector<1x16xf32>
    %18 = arith.select %16, %14, %17 : vector<1x16xi1>, vector<1x16xf32>
    %19 = arith.addf %10, %18 : vector<1x16xf32>
    %c2_i32 = arith.constant 2 : i32
    %20 = arith.index_cast %c2_i32 : i32 to index
    %21 = memref.load %arg1[%20] : memref<8xi32, #tpu.memory_space<smem>>
    %22 = arith.index_cast %c2_i32 : i32 to index
    %c0_3 = arith.constant 0 : index
    %23 = vector.load %arg2[%22, %c0_3] : memref<8x16xf32, #tpu.memory_space<vmem>>, vector<1x16xf32>
    %24 = vector.broadcast %21 : i32 to vector<1x16xi32>
    %25 = arith.cmpi eq, %0, %24 : vector<1x16xi32>
    %cst_4 = arith.constant 0.000000e+00 : f32
    %26 = vector.broadcast %cst_4 : f32 to vector<1x16xf32>
    %27 = arith.select %25, %23, %26 : vector<1x16xi1>, vector<1x16xf32>
    %28 = arith.addf %19, %27 : vector<1x16xf32>
    %c3_i32 = arith.constant 3 : i32
    %29 = arith.index_cast %c3_i32 : i32 to index
    %30 = memref.load %arg1[%29] : memref<8xi32, #tpu.memory_space<smem>>
    %31 = arith.index_cast %c3_i32 : i32 to index
    %c0_5 = arith.constant 0 : index
    %32 = vector.load %arg2[%31, %c0_5] : memref<8x16xf32, #tpu.memory_space<vmem>>, vector<1x16xf32>
    %33 = vector.broadcast %30 : i32 to vector<1x16xi32>
    %34 = arith.cmpi eq, %0, %33 : vector<1x16xi32>
    %cst_6 = arith.constant 0.000000e+00 : f32
    %35 = vector.broadcast %cst_6 : f32 to vector<1x16xf32>
    %36 = arith.select %34, %32, %35 : vector<1x16xi1>, vector<1x16xf32>
    %37 = arith.addf %28, %36 : vector<1x16xf32>
    %c4_i32 = arith.constant 4 : i32
    %38 = arith.index_cast %c4_i32 : i32 to index
    %39 = memref.load %arg1[%38] : memref<8xi32, #tpu.memory_space<smem>>
    %40 = arith.index_cast %c4_i32 : i32 to index
    %c0_7 = arith.constant 0 : index
    %41 = vector.load %arg2[%40, %c0_7] : memref<8x16xf32, #tpu.memory_space<vmem>>, vector<1x16xf32>
    %42 = vector.broadcast %39 : i32 to vector<1x16xi32>
    %43 = arith.cmpi eq, %0, %42 : vector<1x16xi32>
    %cst_8 = arith.constant 0.000000e+00 : f32
    %44 = vector.broadcast %cst_8 : f32 to vector<1x16xf32>
    %45 = arith.select %43, %41, %44 : vector<1x16xi1>, vector<1x16xf32>
    %46 = arith.addf %37, %45 : vector<1x16xf32>
    %c5_i32 = arith.constant 5 : i32
    %47 = arith.index_cast %c5_i32 : i32 to index
    %48 = memref.load %arg1[%47] : memref<8xi32, #tpu.memory_space<smem>>
    %49 = arith.index_cast %c5_i32 : i32 to index
    %c0_9 = arith.constant 0 : index
    %50 = vector.load %arg2[%49, %c0_9] : memref<8x16xf32, #tpu.memory_space<vmem>>, vector<1x16xf32>
    %51 = vector.broadcast %48 : i32 to vector<1x16xi32>
    %52 = arith.cmpi eq, %0, %51 : vector<1x16xi32>
    %cst_10 = arith.constant 0.000000e+00 : f32
    %53 = vector.broadcast %cst_10 : f32 to vector<1x16xf32>
    %54 = arith.select %52, %50, %53 : vector<1x16xi1>, vector<1x16xf32>
    %55 = arith.addf %46, %54 : vector<1x16xf32>
    %c6_i32 = arith.constant 6 : i32
    %56 = arith.index_cast %c6_i32 : i32 to index
    %57 = memref.load %arg1[%56] : memref<8xi32, #tpu.memory_space<smem>>
    %58 = arith.index_cast %c6_i32 : i32 to index
    %c0_11 = arith.constant 0 : index
    %59 = vector.load %arg2[%58, %c0_11] : memref<8x16xf32, #tpu.memory_space<vmem>>, vector<1x16xf32>
    %60 = vector.broadcast %57 : i32 to vector<1x16xi32>
    %61 = arith.cmpi eq, %0, %60 : vector<1x16xi32>
    %cst_12 = arith.constant 0.000000e+00 : f32
    %62 = vector.broadcast %cst_12 : f32 to vector<1x16xf32>
    %63 = arith.select %61, %59, %62 : vector<1x16xi1>, vector<1x16xf32>
    %64 = arith.addf %55, %63 : vector<1x16xf32>
    %c7_i32 = arith.constant 7 : i32
    %65 = arith.index_cast %c7_i32 : i32 to index
    %66 = memref.load %arg1[%65] : memref<8xi32, #tpu.memory_space<smem>>
    %67 = arith.index_cast %c7_i32 : i32 to index
    %c0_13 = arith.constant 0 : index
    %68 = vector.load %arg2[%67, %c0_13] : memref<8x16xf32, #tpu.memory_space<vmem>>, vector<1x16xf32>
    %69 = vector.broadcast %66 : i32 to vector<1x16xi32>
    %70 = arith.cmpi eq, %0, %69 : vector<1x16xi32>
    %cst_14 = arith.constant 0.000000e+00 : f32
    %71 = vector.broadcast %cst_14 : f32 to vector<1x16xf32>
    %72 = arith.select %70, %68, %71 : vector<1x16xi1>, vector<1x16xf32>
    %73 = arith.addf %64, %72 : vector<1x16xf32>
    %c8_i32 = arith.constant 8 : i32
    %74 = vector.shape_cast %73 : vector<1x16xf32> to vector<1x1x16xf32>
    %cst_15 = arith.constant dense<0.000000e+00> : vector<1xf32>
    %75 = vector.multi_reduction <add>, %74, %cst_15 [1, 2] : vector<1x1x16xf32> to vector<1xf32>
    %76 = vector.shape_cast %75 : vector<1xf32> to vector<1x1x1xf32>
    %77 = vector.extract %76[0, 0, 0] : f32 from vector<1x1x1xf32>
    %cst_16 = arith.constant 0.000000e+00 : f32
    %78 = arith.subf %cst_16, %77 : f32
    %cst_17 = arith.constant 1.250000e-01 : f32
    %79 = arith.mulf %78, %cst_17 : f32
    %80 = tpu.iota {dimensions = array<i32: 0>} : vector<64x64xi32>
    %81 = tpu.iota {dimensions = array<i32: 1>} : vector<64x64xi32>
    %82 = arith.cmpi eq, %80, %81 : vector<64x64xi32>
    %cst_18 = arith.constant 1.000000e+00 : f32
    %cst_19 = arith.constant 0.000000e+00 : f32
    %83 = vector.broadcast %cst_18 : f32 to vector<64x64xf32>
    %84 = vector.broadcast %cst_19 : f32 to vector<64x64xf32>
    %85 = arith.select %82, %83, %84 : vector<64x64xi1>, vector<64x64xf32>
    %cst_20 = arith.constant 0.000000e+00 : f32
    %c0_i32_21 = arith.constant 0 : i32
    %86 = arith.index_cast %c0_i32_21 : i32 to index
    %c0_22 = arith.constant 0 : index
    %c0_23 = arith.constant 0 : index
    %87 = vector.load %arg3[%86, %c0_22, %c0_23] : memref<8x64x64xf32, #tpu.memory_space<vmem>>, vector<1x64x64xf32>
    %88 = vector.shape_cast %87 : vector<1x64x64xf32> to vector<64x64xf32>
    %89 = arith.truncf %88 : vector<64x64xf32> to vector<64x64xbf16>
    %cst_24 = arith.constant dense<0.000000e+00> : vector<64x64xf32>
    %90 = tpu.matmul %89, %89, %cst_24 {dimension_numbers = #tpu.dot_dimension_numbers<[1], [1], [0], [0], [0, 0, 1, 0], [], []>} : vector<64x64xbf16>, vector<64x64xbf16>, vector<64x64xf32> -> vector<64x64xf32>
    %91 = arith.subf %90, %85 : vector<64x64xf32>
    %92 = arith.mulf %91, %91 : vector<64x64xf32>
    %93 = vector.shape_cast %92 : vector<64x64xf32> to vector<1x64x64xf32>
    %cst_25 = arith.constant dense<0.000000e+00> : vector<1xf32>
    %94 = vector.multi_reduction <add>, %93, %cst_25 [1, 2] : vector<1x64x64xf32> to vector<1xf32>
    %95 = vector.shape_cast %94 : vector<1xf32> to vector<1x1x1xf32>
    %96 = vector.extract %95[0, 0, 0] : f32 from vector<1x1x1xf32>
    %97 = math.sqrt %96 : f32
    %98 = arith.addf %cst_20, %97 : f32
    %c1_i32_26 = arith.constant 1 : i32
    %99 = arith.index_cast %c1_i32_26 : i32 to index
    %c0_27 = arith.constant 0 : index
    %c0_28 = arith.constant 0 : index
    %100 = vector.load %arg3[%99, %c0_27, %c0_28] : memref<8x64x64xf32, #tpu.memory_space<vmem>>, vector<1x64x64xf32>
    %101 = vector.shape_cast %100 : vector<1x64x64xf32> to vector<64x64xf32>
    %102 = arith.truncf %101 : vector<64x64xf32> to vector<64x64xbf16>
    %cst_29 = arith.constant dense<0.000000e+00> : vector<64x64xf32>
    %103 = tpu.matmul %102, %102, %cst_29 {dimension_numbers = #tpu.dot_dimension_numbers<[1], [1], [0], [0], [0, 0, 1, 0], [], []>} : vector<64x64xbf16>, vector<64x64xbf16>, vector<64x64xf32> -> vector<64x64xf32>
    %104 = arith.subf %103, %85 : vector<64x64xf32>
    %105 = arith.mulf %104, %104 : vector<64x64xf32>
    %106 = vector.shape_cast %105 : vector<64x64xf32> to vector<1x64x64xf32>
    %cst_30 = arith.constant dense<0.000000e+00> : vector<1xf32>
    %107 = vector.multi_reduction <add>, %106, %cst_30 [1, 2] : vector<1x64x64xf32> to vector<1xf32>
    %108 = vector.shape_cast %107 : vector<1xf32> to vector<1x1x1xf32>
    %109 = vector.extract %108[0, 0, 0] : f32 from vector<1x1x1xf32>
    %110 = math.sqrt %109 : f32
    %111 = arith.addf %98, %110 : f32
    %c2_i32_31 = arith.constant 2 : i32
    %112 = arith.index_cast %c2_i32_31 : i32 to index
    %c0_32 = arith.constant 0 : index
    %c0_33 = arith.constant 0 : index
    %113 = vector.load %arg3[%112, %c0_32, %c0_33] : memref<8x64x64xf32, #tpu.memory_space<vmem>>, vector<1x64x64xf32>
    %114 = vector.shape_cast %113 : vector<1x64x64xf32> to vector<64x64xf32>
    %115 = arith.truncf %114 : vector<64x64xf32> to vector<64x64xbf16>
    %cst_34 = arith.constant dense<0.000000e+00> : vector<64x64xf32>
    %116 = tpu.matmul %115, %115, %cst_34 {dimension_numbers = #tpu.dot_dimension_numbers<[1], [1], [0], [0], [0, 0, 1, 0], [], []>} : vector<64x64xbf16>, vector<64x64xbf16>, vector<64x64xf32> -> vector<64x64xf32>
    %117 = arith.subf %116, %85 : vector<64x64xf32>
    %118 = arith.mulf %117, %117 : vector<64x64xf32>
    %119 = vector.shape_cast %118 : vector<64x64xf32> to vector<1x64x64xf32>
    %cst_35 = arith.constant dense<0.000000e+00> : vector<1xf32>
    %120 = vector.multi_reduction <add>, %119, %cst_35 [1, 2] : vector<1x64x64xf32> to vector<1xf32>
    %121 = vector.shape_cast %120 : vector<1xf32> to vector<1x1x1xf32>
    %122 = vector.extract %121[0, 0, 0] : f32 from vector<1x1x1xf32>
    %123 = math.sqrt %122 : f32
    %124 = arith.addf %111, %123 : f32
    %c3_i32_36 = arith.constant 3 : i32
    %125 = arith.index_cast %c3_i32_36 : i32 to index
    %c0_37 = arith.constant 0 : index
    %c0_38 = arith.constant 0 : index
    %126 = vector.load %arg3[%125, %c0_37, %c0_38] : memref<8x64x64xf32, #tpu.memory_space<vmem>>, vector<1x64x64xf32>
    %127 = vector.shape_cast %126 : vector<1x64x64xf32> to vector<64x64xf32>
    %128 = arith.truncf %127 : vector<64x64xf32> to vector<64x64xbf16>
    %cst_39 = arith.constant dense<0.000000e+00> : vector<64x64xf32>
    %129 = tpu.matmul %128, %128, %cst_39 {dimension_numbers = #tpu.dot_dimension_numbers<[1], [1], [0], [0], [0, 0, 1, 0], [], []>} : vector<64x64xbf16>, vector<64x64xbf16>, vector<64x64xf32> -> vector<64x64xf32>
    %130 = arith.subf %129, %85 : vector<64x64xf32>
    %131 = arith.mulf %130, %130 : vector<64x64xf32>
    %132 = vector.shape_cast %131 : vector<64x64xf32> to vector<1x64x64xf32>
    %cst_40 = arith.constant dense<0.000000e+00> : vector<1xf32>
    %133 = vector.multi_reduction <add>, %132, %cst_40 [1, 2] : vector<1x64x64xf32> to vector<1xf32>
    %134 = vector.shape_cast %133 : vector<1xf32> to vector<1x1x1xf32>
    %135 = vector.extract %134[0, 0, 0] : f32 from vector<1x1x1xf32>
    %136 = math.sqrt %135 : f32
    %137 = arith.addf %124, %136 : f32
    %c4_i32_41 = arith.constant 4 : i32
    %138 = arith.index_cast %c4_i32_41 : i32 to index
    %c0_42 = arith.constant 0 : index
    %c0_43 = arith.constant 0 : index
    %139 = vector.load %arg3[%138, %c0_42, %c0_43] : memref<8x64x64xf32, #tpu.memory_space<vmem>>, vector<1x64x64xf32>
    %140 = vector.shape_cast %139 : vector<1x64x64xf32> to vector<64x64xf32>
    %141 = arith.truncf %140 : vector<64x64xf32> to vector<64x64xbf16>
    %cst_44 = arith.constant dense<0.000000e+00> : vector<64x64xf32>
    %142 = tpu.matmul %141, %141, %cst_44 {dimension_numbers = #tpu.dot_dimension_numbers<[1], [1], [0], [0], [0, 0, 1, 0], [], []>} : vector<64x64xbf16>, vector<64x64xbf16>, vector<64x64xf32> -> vector<64x64xf32>
    %143 = arith.subf %142, %85 : vector<64x64xf32>
    %144 = arith.mulf %143, %143 : vector<64x64xf32>
    %145 = vector.shape_cast %144 : vector<64x64xf32> to vector<1x64x64xf32>
    %cst_45 = arith.constant dense<0.000000e+00> : vector<1xf32>
    %146 = vector.multi_reduction <add>, %145, %cst_45 [1, 2] : vector<1x64x64xf32> to vector<1xf32>
    %147 = vector.shape_cast %146 : vector<1xf32> to vector<1x1x1xf32>
    %148 = vector.extract %147[0, 0, 0] : f32 from vector<1x1x1xf32>
    %149 = math.sqrt %148 : f32
    %150 = arith.addf %137, %149 : f32
    %c5_i32_46 = arith.constant 5 : i32
    %151 = arith.index_cast %c5_i32_46 : i32 to index
    %c0_47 = arith.constant 0 : index
    %c0_48 = arith.constant 0 : index
    %152 = vector.load %arg3[%151, %c0_47, %c0_48] : memref<8x64x64xf32, #tpu.memory_space<vmem>>, vector<1x64x64xf32>
    %153 = vector.shape_cast %152 : vector<1x64x64xf32> to vector<64x64xf32>
    %154 = arith.truncf %153 : vector<64x64xf32> to vector<64x64xbf16>
    %cst_49 = arith.constant dense<0.000000e+00> : vector<64x64xf32>
    %155 = tpu.matmul %154, %154, %cst_49 {dimension_numbers = #tpu.dot_dimension_numbers<[1], [1], [0], [0], [0, 0, 1, 0], [], []>} : vector<64x64xbf16>, vector<64x64xbf16>, vector<64x64xf32> -> vector<64x64xf32>
    %156 = arith.subf %155, %85 : vector<64x64xf32>
    %157 = arith.mulf %156, %156 : vector<64x64xf32>
    %158 = vector.shape_cast %157 : vector<64x64xf32> to vector<1x64x64xf32>
    %cst_50 = arith.constant dense<0.000000e+00> : vector<1xf32>
    %159 = vector.multi_reduction <add>, %158, %cst_50 [1, 2] : vector<1x64x64xf32> to vector<1xf32>
    %160 = vector.shape_cast %159 : vector<1xf32> to vector<1x1x1xf32>
    %161 = vector.extract %160[0, 0, 0] : f32 from vector<1x1x1xf32>
    %162 = math.sqrt %161 : f32
    %163 = arith.addf %150, %162 : f32
    %c6_i32_51 = arith.constant 6 : i32
    %164 = arith.index_cast %c6_i32_51 : i32 to index
    %c0_52 = arith.constant 0 : index
    %c0_53 = arith.constant 0 : index
    %165 = vector.load %arg3[%164, %c0_52, %c0_53] : memref<8x64x64xf32, #tpu.memory_space<vmem>>, vector<1x64x64xf32>
    %166 = vector.shape_cast %165 : vector<1x64x64xf32> to vector<64x64xf32>
    %167 = arith.truncf %166 : vector<64x64xf32> to vector<64x64xbf16>
    %cst_54 = arith.constant dense<0.000000e+00> : vector<64x64xf32>
    %168 = tpu.matmul %167, %167, %cst_54 {dimension_numbers = #tpu.dot_dimension_numbers<[1], [1], [0], [0], [0, 0, 1, 0], [], []>} : vector<64x64xbf16>, vector<64x64xbf16>, vector<64x64xf32> -> vector<64x64xf32>
    %169 = arith.subf %168, %85 : vector<64x64xf32>
    %170 = arith.mulf %169, %169 : vector<64x64xf32>
    %171 = vector.shape_cast %170 : vector<64x64xf32> to vector<1x64x64xf32>
    %cst_55 = arith.constant dense<0.000000e+00> : vector<1xf32>
    %172 = vector.multi_reduction <add>, %171, %cst_55 [1, 2] : vector<1x64x64xf32> to vector<1xf32>
    %173 = vector.shape_cast %172 : vector<1xf32> to vector<1x1x1xf32>
    %174 = vector.extract %173[0, 0, 0] : f32 from vector<1x1x1xf32>
    %175 = math.sqrt %174 : f32
    %176 = arith.addf %163, %175 : f32
    %c7_i32_56 = arith.constant 7 : i32
    %177 = arith.index_cast %c7_i32_56 : i32 to index
    %c0_57 = arith.constant 0 : index
    %c0_58 = arith.constant 0 : index
    %178 = vector.load %arg3[%177, %c0_57, %c0_58] : memref<8x64x64xf32, #tpu.memory_space<vmem>>, vector<1x64x64xf32>
    %179 = vector.shape_cast %178 : vector<1x64x64xf32> to vector<64x64xf32>
    %180 = arith.truncf %179 : vector<64x64xf32> to vector<64x64xbf16>
    %cst_59 = arith.constant dense<0.000000e+00> : vector<64x64xf32>
    %181 = tpu.matmul %180, %180, %cst_59 {dimension_numbers = #tpu.dot_dimension_numbers<[1], [1], [0], [0], [0, 0, 1, 0], [], []>} : vector<64x64xbf16>, vector<64x64xbf16>, vector<64x64xf32> -> vector<64x64xf32>
    %182 = arith.subf %181, %85 : vector<64x64xf32>
    %183 = arith.mulf %182, %182 : vector<64x64xf32>
    %184 = vector.shape_cast %183 : vector<64x64xf32> to vector<1x64x64xf32>
    %cst_60 = arith.constant dense<0.000000e+00> : vector<1xf32>
    %185 = vector.multi_reduction <add>, %184, %cst_60 [1, 2] : vector<1x64x64xf32> to vector<1xf32>
    %186 = vector.shape_cast %185 : vector<1xf32> to vector<1x1x1xf32>
    %187 = vector.extract %186[0, 0, 0] : f32 from vector<1x1x1xf32>
    %188 = math.sqrt %187 : f32
    %189 = arith.addf %176, %188 : f32
    %c8_i32_61 = arith.constant 8 : i32
    %cst_62 = arith.constant 1.250000e-01 : f32
    %190 = arith.mulf %189, %cst_62 : f32
    %cst_63 = arith.constant 1.000000e-03 : f32
    %191 = arith.mulf %190, %cst_63 : f32
    %192 = arith.addf %79, %191 : f32
    %c0_64 = arith.constant 0 : index
    %193 = memref.load %arg4[%c0_64] : memref<1xf32, #tpu.memory_space<smem>>
    memref.store %192, %arg4[%c0_64] : memref<1xf32, #tpu.memory_space<smem>>
    return
  }
  func.func @transform_0(%arg0: i32, %arg1: memref<8xi32, #tpu.memory_space<smem>>) -> (i32, i32) {
    %c0_i32 = arith.constant 0 : i32
    %c0_i32_0 = arith.constant 0 : i32
    %c0_i32_1 = arith.constant 0 : i32
    return %c0_i32, %c0_i32_0 : i32, i32
  }
  func.func @transform_1(%arg0: i32, %arg1: memref<8xi32, #tpu.memory_space<smem>>) -> (i32, i32, i32) {
    %c0_i32 = arith.constant 0 : i32
    %c0_i32_0 = arith.constant 0 : i32
    %c0_i32_1 = arith.constant 0 : i32
    %c0_i32_2 = arith.constant 0 : i32
    return %c0_i32, %c0_i32_0, %c0_i32_1 : i32, i32, i32
  }
  func.func @transform_2(%arg0: i32, %arg1: memref<8xi32, #tpu.memory_space<smem>>) -> i32 {
    %c0_i32 = arith.constant 0 : i32
    %c0_i32_0 = arith.constant 0 : i32
    return %c0_i32 : i32
  }
}

</mosaic_0001>

<bundles_post_ra>
// kernel: tpu_custom_call.1
= control target key start
LH: loop header
LB: loop body
LE: loop exit
PB: predicated region body
PF: predicated region fallthrough
CT: control target
= control target key end

     0   :  { %s1210_s15 = smov [#allocation3]   ;;  %s1560_s0 = inlined_call_operand.hbm [shape: s32[8], index: 0, kind: input, shape index: {}]   ;;  %s1561_s1 = inlined_call_operand.hbm [shape: f32[8,16], index: 1, kind: input, shape index: {}]   ;;  %s1562_s2 = inlined_call_operand.hbm [shape: f32[8,64,64], index: 2, kind: input, shape index: {}]   ;;  %s1563_s3 = inlined_call_operand.hbm [shape: f32[1], index: 3, kind: output, shape index: {}]  }
   0x1   :  { %s9_s14 = sshll.u32 %s1560_s0, 4  ;;  %s10_s14 = int_to_ptr.hbm [resolvable:$true] %s9_s14 }
   0x2   :  { %12 = dma.hbm_to_smem %s10_s14, 16, %s1210_s15, [#allocation2] }
   0x3   :  { %1202 = dma.done.wait [#allocation2], 16 }
   0x4   :  { %1203 = vsyncadd [#allocation2], 4294967280 }
   0x5   :  { %15 = sfence }
   0x6   :  { %16 = vsyncpa [#allocation5], 0 }
   0x7   :  { %17 = vsyncpa [#allocation8], 0 }
   0x8   :  { %18 = vsyncpa [#allocation6], 0  ;;  %s24_s18 = sshll.u32 %s1561_s1, 4  ;;  %s1211_s19 = smov [#allocation4]   ;;  %s25_s18 = int_to_ptr.hbm [resolvable:$true] %s24_s18 }
   0x9   :  { %s26_s20 = sshll.u32 %s1211_s19, 4  ;;  %s34_s0 = sshll.u32 %s1562_s2, 4  ;;  %s27_s20 = int_to_ptr.vmem [resolvable:$true] %s26_s20  ;;  %s35_s0 = int_to_ptr.hbm [resolvable:$true] %s34_s0 }
   0xa   :  { %29 = dma.hbm_to_vmem [thread:$0]  %s25_s18, 128, %s27_s20, [#allocation5]  }
   0xb   :  { %s1212_s23 = smov [#allocation7]   ;;  %s1213_s25 = smov 128  }
   0xc   :  { %s36_s24 = sshll.u32 %s1212_s23, 4  ;;  %s1214_s26 = smov 8   ;;  %s37_s24 = int_to_ptr.vmem [resolvable:$true] %s36_s24 }
   0xd   :  { %42 = dma.hbm_to_vmem [thread:$0]  %s35_s0, 8192, %s37_s24, [#allocation8], %s1213_s25, %s1213_s25, %s1214_s26  }
   0xe   :  { %1204 = dma.done.wait [#allocation5], 128  }
   0xf   :  { %1205 = vsyncadd [#allocation5], 4294967168 }
  0x10   :  { %1206 = dma.done.wait [#allocation8], 8192  }
  0x11   :  { %1207 = vsyncadd [#allocation8], 4294959104  ;;  %v146_v0 = vld [vmem:[#allocation7 + $0x30] sm:$0xff]  ;;  %v147_v1 = vld [vmem:[#allocation7 + $0x38] sm:$0xff]  ;;  %vm152_vm0 = vcmask 523264   ;;  %s54_s1 = sld [smem:[#allocation3]]  ;;  %v52_v63 = vlaneseq }
  0x12   :  { %v1246_v2 = vpack.c.bf16 %v147_v1, %v146_v0  ;;  %v144_v3 = vld [vmem:[#allocation7 + $0x20] sm:$0xff]  ;;  %v145_v4 = vld [vmem:[#allocation7 + $0x28] sm:$0xff]  ;;  %v256_v5 = vld [vmem:[#allocation7 + $0x70] sm:$0xff]  ;;  %s1034_s2 = sld [smem:[#allocation3 + $0x1]]  ;;  %vm102_vm9 = vcmask 122880  }
  0x13   :  { %v257_v6 = vld [vmem:[#allocation7 + $0x78] sm:$0xff]  ;;  %v254_v9 = vld [vmem:[#allocation7 + $0x60] sm:$0xff]  ;;  %v255_v10 = vld [vmem:[#allocation7 + $0x68] sm:$0xff]  ;;  %v150_v11 = vpack.c.bf16 %v145_v4, %v144_v3  ;;  %s1035_s27 = sld [smem:[#allocation3 + $0x2]]  ;;  %v1287_v1 = vand.u32 127, %v52_v63 }
  0x14   :  { %v163_v7 = vsel %vm152_vm0, %v1246_v2, 0  ;;  %v261_v8 = vpack.c.bf16 %v257_v6, %v256_v5  ;;  %v260_v13 = vpack.c.bf16 %v255_v10, %v254_v9  ;;  %v142_v15 = vld [vmem:[#allocation7 + $0x10] sm:$0xff]  ;;  %v143_v16 = vld [vmem:[#allocation7 + $0x18] sm:$0xff]  ;;  %v140_v23 = vld [vmem:[#allocation7] sm:$0xff]  ;;  %s1036_s28 = sld [smem:[#allocation3 + $0x3]] }
  0x15   :  { %169 = vmatpush.bf16.xpose.msra.mxu0 %v163_v7  ;;  %v160_v14 = vsel %vm152_vm0, %v150_v11, 0  ;;  %v252_v18 = vld [vmem:[#allocation7 + $0x50] sm:$0xff]  ;;  %v253_v19 = vld [vmem:[#allocation7 + $0x58] sm:$0xff]  ;;  %v149_v20 = vpack.c.bf16 %v143_v16, %v142_v15  ;;  %v141_v24 = vld [vmem:[#allocation7 + $0x8] sm:$0xff]  ;;  %s1037_s29 = sld [smem:[#allocation3 + $0x4]] }
  0x16   :  { %v272_v12 = vsel %vm152_vm0, %v261_v8, 0  ;;  %v269_v17 = vsel %vm152_vm0, %v260_v13, 0  ;;  %v259_v21 = vpack.c.bf16 %v253_v19, %v252_v18  ;;  %v250_v26 = vld [vmem:[#allocation7 + $0x40] sm:$0xff]  ;;  %v251_v27 = vld [vmem:[#allocation7 + $0x48] sm:$0xff]  ;;  %v148_v28 = vpack.c.bf16 %v141_v24, %v140_v23  ;;  %v365_v32 = vld [vmem:[#allocation7 + $0xb0] sm:$0xff]  ;;  %s1038_s30 = sld [smem:[#allocation3 + $0x5]] }
  0x17   :  { %278 = vmatpush.bf16.xpose.msra.mxu1 %v272_v12  ;;  %v157_v22 = vsel %vm152_vm0, %v149_v20, 0  ;;  %v258_v29 = vpack.c.bf16 %v251_v27, %v250_v26  ;;  %v366_v33 = vld [vmem:[#allocation7 + $0xb8] sm:$0xff]  ;;  %v363_v35 = vld [vmem:[#allocation7 + $0xa0] sm:$0xff]  ;;  %v364_v36 = vld [vmem:[#allocation7 + $0xa8] sm:$0xff]  ;;  %v56_v3 = vstv %s54_s1  ;;  %s1039_s4 = sld [smem:[#allocation3 + $0x6]] }
  0x18   :  { %v266_v25 = vsel %vm152_vm0, %v259_v21, 0  ;;  %v154_v30 = vsel %vm152_vm0, %v148_v28, 0  ;;  %v370_v34 = vpack.c.bf16 %v366_v33, %v365_v32  ;;  %v369_v38 = vpack.c.bf16 %v364_v36, %v363_v35  ;;  %v361_v40 = vld [vmem:[#allocation7 + $0x90] sm:$0xff]  ;;  %v362_v41 = vld [vmem:[#allocation7 + $0x98] sm:$0xff]  ;;  %v359_v44 = vld [vmem:[#allocation7 + $0x80] sm:$0xff]  ;;  %s1040_s5 = sld [smem:[#allocation3 + $0x7]] }
  0x19   :  { %v263_v31 = vsel %vm152_vm0, %v258_v29, 0  ;;  %v368_v42 = vpack.c.bf16 %v362_v41, %v361_v40  ;;  %v360_v45 = vld [vmem:[#allocation7 + $0x88] sm:$0xff]  ;;  %v474_v48 = vld [vmem:[#allocation7 + $0xf0] sm:$0xff]  ;;  %v475_v49 = vld [vmem:[#allocation7 + $0xf8] sm:$0xff]  ;;  %v62_v4 = vstv %s1034_s2  ;;  %vm57_vm1 = vcmp.eq.s32.totalorder %v1287_v1, %v56_v3 }
  0x1a   :  { %v381_v37 = vsel %vm152_vm0, %v370_v34, 0  ;;  %v378_v39 = vsel %vm152_vm0, %v369_v38, 0  ;;  %v367_v46 = vpack.c.bf16 %v360_v45, %v359_v44  ;;  %v1273_v50 = vpack.c.bf16 %v475_v49, %v474_v48  ;;  %v472_v52 = vld [vmem:[#allocation7 + $0xe0] sm:$0xff]  ;;  %v473_v53 = vld [vmem:[#allocation7 + $0xe8] sm:$0xff]  ;;  %v470_v56 = vld [vmem:[#allocation7 + $0xd0] sm:$0xff] }
  0x1b   :  { %387 = vmatpush.bf16.xpose.msra.mxu2 %v381_v37  ;;  %v375_v43 = vsel %vm152_vm0, %v368_v42, 0  ;;  %v1278_v54 = vpack.c.bf16 %v473_v53, %v472_v52  ;;  %v471_v57 = vld [vmem:[#allocation7 + $0xd8] sm:$0xff]  ;;  %v468_v60 = vld [vmem:[#allocation7 + $0xc0] sm:$0xff]  ;;  %v469_v61 = vld [vmem:[#allocation7 + $0xc8] sm:$0xff]  ;;  %vm63_vm2 = vcmp.eq.s32.totalorder %v1287_v1, %v62_v4  ;;  %v68_v10 = vstv %s1035_s27 }
  0x1c   :  { %v372_v47 = vsel %vm152_vm0, %v367_v46, 0  ;;  %v490_v51 = vsel %vm152_vm0, %v1273_v50, 0  ;;  %v1282_v58 = vpack.c.bf16 %v471_v57, %v470_v56  ;;  %v476_v62 = vpack.c.bf16 %v469_v61, %v468_v60  ;;  %v55_v5 = vld [vmem:[#allocation4] sm:$0x1]  ;;  %v61_v6 = vld [vmem:[#allocation4 + $0x1] sm:$0x1] }
  0x1d   :  { %170 = vmatpush.bf16.xpose.msra.mxu0 %v160_v14  ;;  %496 = vmatpush.bf16.xpose.msra.mxu3 %v490_v51  ;;  %v487_v55 = vsel %vm152_vm0, %v1278_v54, 0  ;;  %v64_v9 = vsel %vm63_vm2, %v61_v6, 0.0  ;;  %v67_v12 = vld [vmem:[#allocation4 + $0x2] sm:$0x1]  ;;  %vm69_vm3 = vcmp.eq.s32.totalorder %v1287_v1, %v68_v10  ;;  %v74_v14 = vstv %s1036_s28  ;;  %v73_v16 = vld [vmem:[#allocation4 + $0x3] sm:$0x1] }
  0x1e   :  { %v484_v59 = vsel %vm152_vm0, %v1282_v58, 0  ;;  %v481_v0 = vsel %vm152_vm0, %v476_v62, 0  ;;  %vm75_vm4 = vcmp.eq.s32.totalorder %v1287_v1, %v74_v14  ;;  %v79_v19 = vld [vmem:[#allocation4 + $0x4] sm:$0x1]  ;;  %v86_v23 = vstv %s1038_s30  ;;  %v85_v24 = vld [vmem:[#allocation4 + $0x5] sm:$0x1] }
  0x1f   :  { %279 = vmatpush.bf16.xpose.msra.mxu1 %v269_v17  ;;  %v80_v17 = vstv %s1037_s29  ;;  %v76_v18 = vsel %vm75_vm4, %v73_v16, 0.0  ;;  %vm87_vm6 = vcmp.eq.s32.totalorder %v1287_v1, %v86_v23  ;;  %v98_v32 = vstv %s1040_s5  ;;  %v97_v33 = vld [vmem:[#allocation4 + $0x7] sm:$0x1]  ;;  %v583_v57 = vld [vmem:[#allocation7 + $0x130] sm:$0xff] }
  0x20   :  { %vm81_vm5 = vcmp.eq.s32.totalorder %v1287_v1, %v80_v17  ;;  %v88_v27 = vsel %vm87_vm6, %v85_v24, 0.0  ;;  %vm99_vm8 = vcmp.eq.s32.totalorder %v1287_v1, %v98_v32  ;;  %v1302_v40 = vshrl.u32 %v52_v63, 7  ;;  %v581_v63 = vld [vmem:[#allocation7 + $0x120] sm:$0xff] }
  0x21   :  { %v100_v35 = vsel %vm99_vm8, %v97_v33, 0.0  ;;  %v1215_v45 = vmov 0.0  }
  0x22   :  { %v117_v41 = vadd.s32 8, %v1302_v40  ;;  %vm124_vm10 = vcmp.eq.s32.totalorder %v1302_v40, %v1287_v1  ;;  %v119_v49 = vadd.s32 24, %v1302_v40  ;;  %v121_v6 = vadd.s32 40, %v1302_v40 }
  0x23   :  { %388 = vmatpush.bf16.xpose.msra.mxu2 %v378_v39 }
  0x24   :  { %vm125_vm11 = vcmp.eq.s32.totalorder %v117_v41, %v1287_v1  ;;  %vm127_vm13 = vcmp.eq.s32.totalorder %v119_v49, %v1287_v1  ;;  %vm129_vm15 = vcmp.eq.s32.totalorder %v121_v6, %v1287_v1 }
  0x25   :  { %171 = vmatpush.bf16.xpose.msra.mxu0 %v157_v22  ;;  %497 = vmatpush.bf16.xpose.msra.mxu3 %v487_v55  ;;  %v82_v22 = vsel %vm81_vm5, %v79_v19, 0.0  ;;  %v120_v55 = vadd.s32 32, %v1302_v40 }
  0x27   :  { %280 = vmatpush.bf16.xpose.msra.mxu1 %v266_v25  ;;  %vm128_vm14 = vcmp.eq.s32.totalorder %v120_v55, %v1287_v1 }
  0x2b   :  { %389 = vmatpush.bf16.xpose.msra.mxu2 %v375_v43  ;;  %v118_v43 = vadd.s32 16, %v1302_v40 }
  0x2d   :  { %172 = vmatpush.bf16.xpose.msra.mxu0 %v154_v30  ;;  %498 = vmatpush.bf16.xpose.msra.mxu3 %v484_v59  ;;  %vm126_vm12 = vcmp.eq.s32.totalorder %v118_v43, %v1287_v1 }
  0x2e   :  { %v1322_v52 = vsel %vm126_vm12, 1.0, %v1215_v45 }
  0x2f   :  { %281 = vmatpush.bf16.xpose.msra.mxu1 %v263_v31 }
  0x33   :  { %390 = vmatpush.bf16.xpose.msra.mxu2 %v372_v47  ;;  %v1315_v47 = vsel %vm125_vm11, 1.0, %v1215_v45 }
  0x34   :  { %1041 = vmatmul.msk.bf16.vlgmr.msra.gmra.mxu0 %vm152_vm0, %v148_v28  ;;  %v92_v28 = vstv %s1039_s4  ;;  %s1022_s4 = sshll.u32 %s1563_s3, 4  ;;  %s1023_s4 = int_to_ptr.hbm [resolvable:$true] %s1022_s4 }
  0x35   :  { %499 = vmatpush.bf16.xpose.msra.mxu3 %v481_v0  ;;  %vm93_vm7 = vcmp.eq.s32.totalorder %v1287_v1, %v92_v28  ;;  %v582_v0 = vld [vmem:[#allocation7 + $0x128] sm:$0xff] }
  0x36   :  { %1045 = vmatmul.msk.bf16.vlgmr.msra.gmra.mxu1 %vm152_vm0, %v258_v29  ;;  %v91_v29 = vld [vmem:[#allocation4 + $0x6] sm:$0x1]  ;;  %v1341_v10 = vpack.c.bf16 %v582_v0, %v581_v63 }
  0x37   :  { %v94_v31 = vsel %vm93_vm7, %v91_v29, 0.0  ;;  %v1363_v29 = vsel %vm129_vm15, 1.0, %v1215_v45 }
  0x3a   :  { %1049 = vmatmul.msk.bf16.vlgmr.msra.gmra.mxu2 %vm152_vm0, %v367_v46  ;;  %v1312_v46 = vsel %vm124_vm10, 1.0, %v1215_v45 }
  0x3c   :  { %1053 = vmatmul.msk.bf16.vlgmr.msra.gmra.mxu3 %vm152_vm0, %v476_v62 }
  0x44   :  { %1042 = vmatmul.msk.bf16.gmra.mxu0 %vm152_vm0, %v149_v20 }
  0x46   :  { %1046 = vmatmul.msk.bf16.gmra.mxu1 %vm152_vm0, %v259_v21 }
  0x4a   :  { %1050 = vmatmul.msk.bf16.gmra.mxu2 %vm152_vm0, %v368_v42 }
  0x4c   :  { %1054 = vmatmul.msk.bf16.gmra.mxu3 %vm152_vm0, %v1282_v58  ;;  %v584_v58 = vld [vmem:[#allocation7 + $0x138] sm:$0xff] }
  0x4d   :  { %v1327_v61 = vpack.c.bf16 %v584_v58, %v583_v57  ;;  %v577_v57 = vld [vmem:[#allocation7 + $0x100] sm:$0xff]  ;;  %v578_v58 = vld [vmem:[#allocation7 + $0x108] sm:$0xff] }
  0x4f   :  { %v599_v3 = vsel %vm152_vm0, %v1327_v61, 0 }
  0x50   :  { %605 = vmatpush.bf16.xpose.msrb.mxu0 %v599_v3 }
  0x54   :  { %1043 = vmatmul.msk.bf16.gmra.mxu0 %vm152_vm0, %v150_v11 }
  0x56   :  { %1047 = vmatmul.msk.bf16.gmra.mxu1 %vm152_vm0, %v260_v13  ;;  %v70_v13 = vsel %vm69_vm3, %v67_v12, 0.0  ;;  %v122_v12 = vadd.s32 48, %v1302_v40 }
  0x5a   :  { %1051 = vmatmul.msk.bf16.gmra.mxu2 %vm152_vm0, %v369_v38 }
  0x5c   :  { %1055 = vmatmul.msk.bf16.gmra.mxu3 %vm152_vm0, %v1278_v54 }
  0x64   :  { %1044 = vmatmul.msk.bf16.gmra.mxu0 %vm152_vm0, %v1246_v2 }
  0x66   :  { %1048 = vmatmul.msk.bf16.gmra.mxu1 %vm152_vm0, %v261_v8  ;;  %v58_v8 = vsel %vm57_vm1, %v55_v5, 0.0  ;;  %v1335_v5 = vsel %vm127_vm13, 1.0, %v1215_v45  ;;  %vm130_vm1 = vcmp.eq.s32.totalorder %v122_v12, %v1287_v1 }
  0x67   :  { %v65_v11 = vadd.f32 %v64_v9, %v58_v8 }
  0x69   :  { %v71_v15 = vadd.f32 %v70_v13, %v65_v11 }
  0x6a   :  { %1052 = vmatmul.msk.bf16.gmra.mxu2 %vm152_vm0, %v370_v34 }
  0x6b   :  { %v77_v21 = vadd.f32 %v76_v18, %v71_v15  ;;  %v1350_v15 = vsel %vm128_vm14, 1.0, %v1215_v45 }
  0x6c   :  { %1056 = vmatmul.msk.bf16.gmra.mxu3 %vm152_vm0, %v1273_v50 }
  0x6d   :  { %v83_v26 = vadd.f32 %v82_v22, %v77_v21  ;;  %v579_v21 = vld [vmem:[#allocation7 + $0x110] sm:$0xff]  ;;  %v580_v22 = vld [vmem:[#allocation7 + $0x118] sm:$0xff] }
  0x6e   :  { %v586_v33 = vpack.c.bf16 %v580_v22, %v579_v21 }
  0x6f   :  { %v89_v30 = vadd.f32 %v88_v27, %v83_v26 }
  0x71   :  { %v95_v34 = vadd.f32 %v94_v31, %v89_v30 }
  0x73   :  { %v101_v37 = vadd.f32 %v100_v35, %v95_v34  ;;  %v1368_v34 = vsel %vm130_vm1, 1.0, %v1215_v45 }
  0x75   :  { %v103_v39 = vsel %vm102_vm9, %v101_v37, 0.0 }
  0x76   :  { %104 = vadd.xlane.f32.xlu0 %v103_v39 }
  0xb1   :  { %v1289_v2 = vpop.f32.mrf.mxu0 }
  0xb2   :  { %v194_v54 = vsub.f32 %v1289_v2, %v1312_v46  ;;  %v596_v2 = vsel %vm152_vm0, %v1341_v10, 0 }
  0xb3   :  { %v283_v7 = vpop.f32.mrf.mxu1  ;;  %606 = vmatpush.bf16.xpose.msrb.mxu0 %v596_v2 }
  0xb4   :  { %v303_v48 = vsub.f32 %v283_v7, %v1312_v46  ;;  %v202_v23 = vmul.f32 %v194_v54, %v194_v54 }
  0xb6   :  { %v311_v53 = vmul.f32 %v303_v48, %v303_v48  ;;  %v210_v39 = vsel %vm152_vm0, %v202_v23, 0.0 }
  0xb8   :  { %v319_v4 = vsel %vm152_vm0, %v311_v53, 0.0  ;;  %v593_v53 = vsel %vm152_vm0, %v586_v33, 0 }
  0xb9   :  { %v1297_v20 = vpop.f32.mrf.mxu0 }
  0xba   :  { %v195_v11 = vsub.f32 %v1297_v20, %v1315_v47 }
  0xbb   :  { %v285_v25 = vpop.f32.mrf.mxu1  ;;  %607 = vmatpush.bf16.xpose.msrb.mxu0 %v593_v53 }
  0xbc   :  { %v304_v51 = vsub.f32 %v285_v25, %v1315_v47  ;;  %v203_v24 = vmul.f32 %v195_v11, %v195_v11 }
  0xbe   :  { %v312_v59 = vmul.f32 %v304_v51, %v304_v51  ;;  %v211_v35 = vsel %vm152_vm0, %v203_v24, 0.0 }
  0xbf   :  { %v212_v55 = vadd.f32 %v211_v35, %v210_v39  ;;  %v692_v35 = vld [vmem:[#allocation7 + $0x170] sm:$0xff] }
  0xc0   :  { %v320_v7 = vsel %vm152_vm0, %v312_v59, 0.0 }
  0xc1   :  { %v179_v36 = vpop.f32.mrf.mxu0  ;;  %v321_v14 = vadd.f32 %v320_v7, %v319_v4  ;;  %v585_v7 = vpack.c.bf16 %v578_v58, %v577_v57 }
  0xc2   :  { %v196_v13 = vsub.f32 %v179_v36, %v1322_v52 }
  0xc3   :  { %v288_v38 = vpop.f32.mrf.mxu1 }
  0xc4   :  { %v305_v60 = vsub.f32 %v288_v38, %v1322_v52  ;;  %v204_v26 = vmul.f32 %v196_v13, %v196_v13  ;;  %v123_v38 = vadd.s32 56, %v1302_v40 }
  0xc6   :  { %v313_v8 = vmul.f32 %v305_v60, %v305_v60  ;;  %v213_v41 = vsel %vm152_vm0, %v204_v26, 0.0  ;;  %vm131_vm2 = vcmp.eq.s32.totalorder %v123_v38, %v1287_v1 }
  0xc8   :  { %v322_v17 = vsel %vm152_vm0, %v313_v8, 0.0 }
  0xc9   :  { %v181_v42 = vpop.f32.mrf.mxu0  ;;  %v323_v28 = vadd.f32 %v322_v17, %v321_v14  ;;  %v590_v17 = vsel %vm152_vm0, %v585_v7, 0 }
  0xca   :  { %v197_v25 = vsub.f32 %v181_v42, %v1335_v5  ;;  %608 = vmatpush.bf16.xpose.msrb.mxu0 %v590_v17 }
  0xcb   :  { %v290_v44 = vpop.f32.mrf.mxu1 }
  0xcc   :  { %v306_v9 = vsub.f32 %v290_v44, %v1335_v5  ;;  %v205_v36 = vmul.f32 %v197_v25, %v197_v25 }
  0xce   :  { %v314_v18 = vmul.f32 %v306_v9, %v306_v9  ;;  %v215_v40 = vsel %vm152_vm0, %v205_v36, 0.0  ;;  %v1386_v9 = vsel %vm131_vm2, 1.0, %v1215_v45  ;;  %v693_v36 = vld [vmem:[#allocation7 + $0x178] sm:$0xff] }
  0xd0   :  { %v324_v30 = vsel %vm152_vm0, %v314_v18, 0.0 }
  0xd1   :  { %v184_v56 = vpop.f32.mrf.mxu0  ;;  %v325_v43 = vadd.f32 %v324_v30, %v323_v28  ;;  %1057 = vmatmul.msk.bf16.vlgmr.msrb.gmra.mxu0 %vm152_vm0, %v585_v7 }
  0xd2   :  { %v198_v27 = vsub.f32 %v184_v56, %v1350_v15 }
  0xd3   :  { %v293_v62 = vpop.f32.mrf.mxu1 }
  0xd4   :  { %v307_v19 = vsub.f32 %v293_v62, %v1350_v15  ;;  %v206_v42 = vmul.f32 %v198_v27, %v198_v27  ;;  %v214_v62 = vadd.f32 %v213_v41, %v212_v55 }
  0xd6   :  { %v315_v31 = vmul.f32 %v307_v19, %v307_v19  ;;  %v217_v63 = vsel %vm152_vm0, %v206_v42, 0.0  ;;  %v216_v8 = vadd.f32 %v215_v40, %v214_v62 }
  0xd8   :  { %v326_v49 = vsel %vm152_vm0, %v315_v31, 0.0  ;;  %v218_v54 = vadd.f32 %v217_v63, %v216_v8 }
  0xd9   :  { %v186_v16 = vpop.f32.mrf.mxu0  ;;  %v327_v0 = vadd.f32 %v326_v49, %v325_v43 }
  0xda   :  { %v199_v37 = vsub.f32 %v186_v16, %v1363_v29  ;;  %v392_v16 = vpop.f32.mrf.mxu2 }
  0xdb   :  { %v295_v20 = vpop.f32.mrf.mxu1  ;;  %v412_v31 = vsub.f32 %v392_v16, %v1312_v46 }
  0xdc   :  { %v308_v32 = vsub.f32 %v295_v20, %v1363_v29  ;;  %v207_v59 = vmul.f32 %v199_v37, %v199_v37  ;;  %v1400_v37 = vpack.c.bf16 %v693_v36, %v692_v35 }
  0xdd   :  { %v420_v39 = vmul.f32 %v412_v31, %v412_v31 }
  0xde   :  { %v316_v51 = vmul.f32 %v308_v32, %v308_v32  ;;  %v219_v1 = vsel %vm152_vm0, %v207_v59, 0.0  ;;  %v708_v38 = vsel %vm152_vm0, %v1400_v37, 0 }
  0xdf   :  { %v220_v18 = vadd.f32 %v219_v1, %v218_v54  ;;  %714 = vmatpush.bf16.xpose.msrb.mxu1 %v708_v38  ;;  %v428_v49 = vsel %vm152_vm0, %v420_v39, 0.0 }
  0xe0   :  { %v328_v4 = vsel %vm152_vm0, %v316_v51, 0.0 }
  0xe1   :  { %v189_v44 = vpop.f32.mrf.mxu0  ;;  %v329_v12 = vadd.f32 %v328_v4, %v327_v0  ;;  %1058 = vmatmul.msk.bf16.gmra.mxu0 %vm152_vm0, %v586_v33 }
  0xe2   :  { %v200_v48 = vsub.f32 %v189_v44, %v1368_v34  ;;  %v394_v27 = vpop.f32.mrf.mxu2  ;;  %v690_v44 = vld [vmem:[#allocation7 + $0x160] sm:$0xff] }
  0xe3   :  { %v298_v56 = vpop.f32.mrf.mxu1  ;;  %v413_v32 = vsub.f32 %v394_v27, %v1315_v47  ;;  %v501_v27 = vpop.f32.mrf.mxu3 }
  0xe4   :  { %v309_v60 = vsub.f32 %v298_v56, %v1368_v34  ;;  %v208_v3 = vmul.f32 %v200_v48, %v200_v48  ;;  %v691_v48 = vld [vmem:[#allocation7 + $0x168] sm:$0xff] }
  0xe5   :  { %v421_v41 = vmul.f32 %v413_v32, %v413_v32  ;;  %v696_v33 = vpack.c.bf16 %v691_v48, %v690_v44 }
  0xe6   :  { %v317_v6 = vmul.f32 %v309_v60, %v309_v60  ;;  %v221_v50 = vsel %vm152_vm0, %v208_v3, 0.0 }
  0xe7   :  { %v222_v20 = vadd.f32 %v221_v50, %v220_v18  ;;  %v429_v51 = vsel %vm152_vm0, %v421_v41, 0.0  ;;  %v705_v56 = vsel %vm152_vm0, %v696_v33, 0  ;;  %v801_v41 = vld [vmem:[#allocation7 + $0x1b0] sm:$0xff] }
  0xe8   :  { %v330_v14 = vsel %vm152_vm0, %v317_v6, 0.0  ;;  %v430_v57 = vadd.f32 %v429_v51, %v428_v49  ;;  %715 = vmatpush.bf16.xpose.msrb.mxu1 %v705_v56 }
  0xe9   :  { %v191_v11 = vpop.f32.mrf.mxu0  ;;  %v331_v21 = vadd.f32 %v330_v14, %v329_v12  ;;  %v689_v12 = vld [vmem:[#allocation7 + $0x158] sm:$0xff] }
  0xea   :  { %v201_v13 = vsub.f32 %v191_v11, %v1386_v9  ;;  %v397_v28 = vpop.f32.mrf.mxu2  ;;  %v688_v11 = vld [vmem:[#allocation7 + $0x150] sm:$0xff] }
  0xeb   :  { %v300_v19 = vpop.f32.mrf.mxu1  ;;  %v414_v42 = vsub.f32 %v397_v28, %v1322_v52  ;;  %v695_v14 = vpack.c.bf16 %v689_v12, %v688_v11 }
  0xec   :  { %v209_v2 = vmul.f32 %v201_v13, %v201_v13  ;;  %v310_v45 = vsub.f32 %v300_v19, %v1386_v9 }
  0xed   :  { %v422_v53 = vmul.f32 %v414_v42, %v414_v42  ;;  %v802_v42 = vld [vmem:[#allocation7 + $0x1b8] sm:$0xff] }
  0xee   :  { %v223_v22 = vsel %vm152_vm0, %v209_v2, 0.0  ;;  %v318_v23 = vmul.f32 %v310_v45, %v310_v45  ;;  %v1430_v48 = vpack.c.bf16 %v802_v42, %v801_v41  ;;  %v796_v41 = vld [vmem:[#allocation7 + $0x188] sm:$0xff] }
  0xef   :  { %v224_v24 = vadd.f32 %v223_v22, %v222_v20  ;;  %v431_v58 = vsel %vm152_vm0, %v422_v53, 0.0  ;;  %v686_v20 = vld [vmem:[#allocation7 + $0x140] sm:$0xff] }
  0xf0   :  { %v332_v25 = vsel %vm152_vm0, %v318_v23, 0.0  ;;  %v432_v62 = vadd.f32 %v431_v58, %v430_v57  ;;  %v817_v49 = vsel %vm152_vm0, %v1430_v48, 0  ;;  %v799_v57 = vld [vmem:[#allocation7 + $0x1a0] sm:$0xff]  ;;  %v800_v58 = vld [vmem:[#allocation7 + $0x1a8] sm:$0xff] }
  0xf1   :  { %225 = vadd.xlane.f32.xlu0 %v224_v24  ;;  %v333_v26 = vadd.f32 %v332_v25, %v331_v21  ;;  %1059 = vmatmul.msk.bf16.gmra.mxu0 %vm152_vm0, %v1341_v10  ;;  %v702_v10 = vsel %vm152_vm0, %v695_v14, 0  ;;  %v687_v21 = vld [vmem:[#allocation7 + $0x148] sm:$0xff] }
  0xf2   :  { %v399_v30 = vpop.f32.mrf.mxu2  ;;  %716 = vmatpush.bf16.xpose.msrb.mxu1 %v702_v10  ;;  %v694_v22 = vpack.c.bf16 %v687_v21, %v686_v20  ;;  %823 = vmatpush.bf16.xpose.msrb.mxu2 %v817_v49 }
  0xf3   :  { %334 = vadd.xlane.f32.xlu1 %v333_v26  ;;  %v415_v55 = vsub.f32 %v399_v30, %v1335_v5  ;;  %v105_v26 = vpop.xlane.xlu0 %104 }
  0xf4   :  { %v699_v25 = vsel %vm152_vm0, %v694_v22, 0  ;;  %v106_v28 = vrot.slane %v105_v26, 4 }
  0xf5   :  { %v423_v40 = vmul.f32 %v415_v55, %v415_v55 }
  0xf6   :  { %v107_v30 = vadd.f32 %v106_v28, %v105_v26 }
  0xf7   :  { %v433_v63 = vsel %vm152_vm0, %v423_v40, 0.0 }
  0xf8   :  { %v434_v4 = vadd.f32 %v433_v63, %v432_v62  ;;  %v108_v31 = vrot.slane %v107_v30, 2 }
  0xfa   :  { %v402_v43 = vpop.f32.mrf.mxu2  ;;  %717 = vmatpush.bf16.xpose.msrb.mxu1 %v699_v25  ;;  %v109_v32 = vadd.f32 %v108_v31, %v107_v30 }
  0xfb   :  { %v416_v59 = vsub.f32 %v402_v43, %v1350_v15  ;;  %v521_v43 = vsub.f32 %v501_v27, %v1312_v46 }
  0xfc   :  { %v110_v35 = vrot.slane %v109_v32, 1 }
  0xfd   :  { %v424_v0 = vmul.f32 %v416_v59, %v416_v59  ;;  %v529_v51 = vmul.f32 %v521_v43, %v521_v43 }
  0xfe   :  { %v111_v36 = vadd.f32 %v110_v35, %v109_v32 }
  0xff   :  { %v435_v6 = vsel %vm152_vm0, %v424_v0, 0.0  ;;  %v537_v40 = vsel %vm152_vm0, %v529_v51, 0.0  ;;  %v797_v0 = vld [vmem:[#allocation7 + $0x190] sm:$0xff] }
 0x100   :  { %v436_v54 = vadd.f32 %v435_v6, %v434_v4  ;;  %1073 = vpush %v111_v36 }
 0x101   :  { %1060 = vmatmul.msk.bf16.gmra.mxu0 %vm152_vm0, %v1327_v61  ;;  %1061 = vmatmul.msk.bf16.vlgmr.msrb.gmra.mxu1 %vm152_vm0, %v694_v22  ;;  %v503_v61 = vpop.f32.mrf.mxu3 }
 0x102   :  { %v404_v60 = vpop.f32.mrf.mxu2  ;;  %v522_v44 = vsub.f32 %v503_v61, %v1315_v47 }
 0x103   :  { %v417_v3 = vsub.f32 %v404_v60, %v1363_v29 }
 0x104   :  { %v530_v53 = vmul.f32 %v522_v44, %v522_v44 }
 0x105   :  { %v425_v7 = vmul.f32 %v417_v3, %v417_v3  ;;  %v798_v3 = vld [vmem:[#allocation7 + $0x198] sm:$0xff] }
 0x106   :  { %v538_v59 = vsel %vm152_vm0, %v530_v53, 0.0 }
 0x107   :  { %v437_v50 = vsel %vm152_vm0, %v425_v7, 0.0  ;;  %v539_v4 = vadd.f32 %v538_v59, %v537_v40  ;;  %v908_v40 = vld [vmem:[#allocation7 + $0x1e0] sm:$0xff]  ;;  %v909_v59 = vld [vmem:[#allocation7 + $0x1e8] sm:$0xff] }
 0x108   :  { %v438_v16 = vadd.f32 %v437_v50, %v436_v54 }
 0x109   :  { %v506_v38 = vpop.f32.mrf.mxu3 }
 0x10a   :  { %v407_v8 = vpop.f32.mrf.mxu2  ;;  %v523_v55 = vsub.f32 %v506_v38, %v1322_v52 }
 0x10b   :  { %v418_v1 = vsub.f32 %v407_v8, %v1368_v34 }
 0x10c   :  { %v531_v60 = vmul.f32 %v523_v55, %v523_v55 }
 0x10d   :  { %v426_v13 = vmul.f32 %v418_v1, %v418_v1  ;;  %v804_v1 = vpack.c.bf16 %v798_v3, %v797_v0 }
 0x10e   :  { %v540_v6 = vsel %vm152_vm0, %v531_v60, 0.0 }
 0x10f   :  { %v439_v17 = vsel %vm152_vm0, %v426_v13, 0.0  ;;  %v541_v11 = vadd.f32 %v540_v6, %v539_v4  ;;  %v1465_v4 = vpack.c.bf16 %v909_v59, %v908_v40 }
 0x110   :  { %v440_v2 = vadd.f32 %v439_v17, %v438_v16 }
 0x111   :  { %1062 = vmatmul.msk.bf16.gmra.mxu1 %vm152_vm0, %v695_v14  ;;  %v508_v39 = vpop.f32.mrf.mxu3  ;;  %v811_v14 = vsel %vm152_vm0, %v804_v1, 0 }
 0x112   :  { %v409_v18 = vpop.f32.mrf.mxu2  ;;  %v524_v62 = vsub.f32 %v508_v39, %v1335_v5  ;;  %v795_v39 = vld [vmem:[#allocation7 + $0x180] sm:$0xff] }
 0x113   :  { %v419_v19 = vsub.f32 %v409_v18, %v1386_v9  ;;  %v803_v42 = vpack.c.bf16 %v796_v41, %v795_v39 }
 0x114   :  { %v532_v7 = vmul.f32 %v524_v62, %v524_v62 }
 0x115   :  { %v427_v45 = vmul.f32 %v419_v19, %v419_v19  ;;  %v808_v43 = vsel %vm152_vm0, %v803_v42, 0 }
 0x116   :  { %v542_v12 = vsel %vm152_vm0, %v532_v7, 0.0 }
 0x117   :  { %v441_v23 = vsel %vm152_vm0, %v427_v45, 0.0  ;;  %v543_v17 = vadd.f32 %v542_v12, %v541_v11  ;;  %v923_v12 = vsel %vm152_vm0, %v1465_v4, 0 }
 0x118   :  { %v442_v24 = vadd.f32 %v441_v23, %v440_v2 }
 0x119   :  { %v511_v56 = vpop.f32.mrf.mxu3 }
 0x11a   :  { %443 = vadd.xlane.f32.xlu1 %v442_v24  ;;  %v525_v8 = vsub.f32 %v511_v56, %v1350_v15  ;;  %v910_v56 = vld [vmem:[#allocation7 + $0x1f0] sm:$0xff] }
 0x11c   :  { %v533_v50 = vmul.f32 %v525_v8, %v525_v8 }
 0x11e   :  { %v544_v18 = vsel %vm152_vm0, %v533_v50, 0.0 }
 0x11f   :  { %v545_v21 = vadd.f32 %v544_v18, %v543_v17 }
 0x121   :  { %1063 = vmatmul.msk.bf16.gmra.mxu1 %vm152_vm0, %v696_v33  ;;  %v1435_v33 = vpack.c.bf16 %v800_v58, %v799_v57  ;;  %v513_v54 = vpop.f32.mrf.mxu3  ;;  %v911_v57 = vld [vmem:[#allocation7 + $0x1f8] sm:$0xff] }
 0x122   :  { %v526_v13 = vsub.f32 %v513_v54, %v1363_v29  ;;  %v1459_v58 = vpack.c.bf16 %v911_v57, %v910_v56 }
 0x123   :  { %v814_v63 = vsel %vm152_vm0, %v1435_v33, 0 }
 0x124   :  { %824 = vmatpush.bf16.xpose.msrb.mxu2 %v814_v63  ;;  %v534_v19 = vmul.f32 %v526_v13, %v526_v13  ;;  %v926_v60 = vsel %vm152_vm0, %v1459_v58, 0  ;;  %v906_v13 = vld [vmem:[#allocation7 + $0x1d0] sm:$0xff] }
 0x125   :  { %932 = vmatpush.bf16.xpose.msrb.mxu3 %v926_v60 }
 0x126   :  { %v546_v22 = vsel %vm152_vm0, %v534_v19, 0.0 }
 0x127   :  { %v547_v26 = vadd.f32 %v546_v22, %v545_v21 }
 0x129   :  { %v516_v45 = vpop.f32.mrf.mxu3 }
 0x12a   :  { %v527_v20 = vsub.f32 %v516_v45, %v1368_v34 }
 0x12c   :  { %825 = vmatpush.bf16.xpose.msrb.mxu2 %v811_v14  ;;  %v535_v23 = vmul.f32 %v527_v20, %v527_v20  ;;  %v907_v14 = vld [vmem:[#allocation7 + $0x1d8] sm:$0xff] }
 0x12d   :  { %933 = vmatpush.bf16.xpose.msrb.mxu3 %v923_v12 }
 0x12e   :  { %v548_v27 = vsel %vm152_vm0, %v535_v23, 0.0 }
 0x12f   :  { %v549_v32 = vadd.f32 %v548_v27, %v547_v26 }
 0x131   :  { %1064 = vmatmul.msk.bf16.gmra.mxu1 %vm152_vm0, %v1400_v37  ;;  %v518_v30 = vpop.f32.mrf.mxu3  ;;  %s1467_s6 = spop %1073 }
 0x132   :  { %v528_v31 = vsub.f32 %v518_v30, %v1386_v9  ;;  %s113_s1 = ssub.f32 0.0, %s1467_s6 }
 0x134   :  { %v536_v61 = vmul.f32 %v528_v31, %v528_v31  ;;  %826 = vmatpush.bf16.xpose.msrb.mxu2 %v808_v43  ;;  %s114_s5 = smul.f32 0.125, %s113_s1 }
 0x136   :  { %v550_v35 = vsel %vm152_vm0, %v536_v61, 0.0 }
 0x137   :  { %v551_v36 = vadd.f32 %v550_v35, %v549_v32 }
 0x139   :  { %552 = vadd.xlane.f32.xlu2 %v551_v36 }
 0x13b   :  { %1065 = vmatmul.msk.bf16.vlgmr.msrb.gmra.mxu2 %vm152_vm0, %v803_v42 }
 0x14b   :  { %1066 = vmatmul.msk.bf16.gmra.mxu2 %vm152_vm0, %v804_v1 }
 0x14e   :  { %v610_v38 = vpop.f32.mrf.mxu0 }
 0x14f   :  { %v630_v53 = vsub.f32 %v610_v38, %v1312_v46 }
 0x151   :  { %v638_v62 = vmul.f32 %v630_v53, %v630_v53 }
 0x153   :  { %v646_v7 = vsel %vm152_vm0, %v638_v62, 0.0 }
 0x156   :  { %v612_v44 = vpop.f32.mrf.mxu0 }
 0x157   :  { %v631_v55 = vsub.f32 %v612_v44, %v1315_v47 }
 0x159   :  { %v639_v63 = vmul.f32 %v631_v55, %v631_v55 }
 0x15b   :  { %v647_v8 = vsel %vm152_vm0, %v639_v63, 0.0  ;;  %1067 = vmatmul.msk.bf16.gmra.mxu2 %vm152_vm0, %v1435_v33 }
 0x15e   :  { %v615_v49 = vpop.f32.mrf.mxu0 }
 0x15f   :  { %v632_v0 = vsub.f32 %v615_v49, %v1322_v52 }
 0x161   :  { %v640_v1 = vmul.f32 %v632_v0, %v632_v0 }
 0x164   :  { %v226_v10 = vpop.xlane.xlu0 %225 }
 0x165   :  { %v227_v16 = vrot.slane %v226_v10, 4 }
 0x166   :  { %v617_v51 = vpop.f32.mrf.mxu0  ;;  %v335_v6 = vpop.xlane.xlu1 %334 }
 0x167   :  { %v228_v2 = vadd.f32 %v227_v16, %v226_v10  ;;  %v633_v54 = vsub.f32 %v617_v51, %v1335_v5  ;;  %v336_v50 = vrot.slane %v335_v6, 4  ;;  %v648_v10 = vadd.f32 %v647_v8, %v646_v7  ;;  %v905_v7 = vld [vmem:[#allocation7 + $0x1c8] sm:$0xff] }
 0x168   :  { %v649_v16 = vsel %vm152_vm0, %v640_v1, 0.0 }
 0x169   :  { %v229_v37 = vrot.slane %v228_v2, 2  ;;  %v641_v17 = vmul.f32 %v633_v54, %v633_v54  ;;  %v337_v45 = vadd.f32 %v336_v50, %v335_v6  ;;  %v650_v20 = vadd.f32 %v649_v16, %v648_v10  ;;  %v904_v6 = vld [vmem:[#allocation7 + $0x1c0] sm:$0xff] }
 0x16a   :  { %v912_v8 = vpack.c.bf16 %v905_v7, %v904_v6 }
 0x16b   :  { %v230_v24 = vadd.f32 %v229_v37, %v228_v2  ;;  %v913_v2 = vpack.c.bf16 %v907_v14, %v906_v13  ;;  %v651_v21 = vsel %vm152_vm0, %v641_v17, 0.0  ;;  %v338_v26 = vrot.slane %v337_v45, 2  ;;  %1068 = vmatmul.msk.bf16.gmra.mxu2 %vm152_vm0, %v1430_v48 }
 0x16c   :  { %v652_v27 = vadd.f32 %v651_v21, %v650_v20  ;;  %v917_v1 = vsel %vm152_vm0, %v912_v8, 0 }
 0x16d   :  { %v231_v25 = vrot.slane %v230_v24, 1  ;;  %v339_v35 = vadd.f32 %v338_v26, %v337_v45 }
 0x16e   :  { %v620_v3 = vpop.f32.mrf.mxu0 }
 0x16f   :  { %v232_v28 = vadd.f32 %v231_v25, %v230_v24  ;;  %v634_v18 = vsub.f32 %v620_v3, %v1350_v15  ;;  %v920_v25 = vsel %vm152_vm0, %v913_v2, 0  ;;  %v340_v44 = vrot.slane %v339_v35, 1 }
 0x170   :  { %934 = vmatpush.bf16.xpose.msrb.mxu3 %v920_v25 }
 0x171   :  { %1075 = vpush %v232_v28  ;;  %v642_v22 = vmul.f32 %v634_v18, %v634_v18  ;;  %v341_v40 = vadd.f32 %v340_v44, %v339_v35 }
 0x173   :  { %v653_v30 = vsel %vm152_vm0, %v642_v22, 0.0 }
 0x174   :  { %v654_v39 = vadd.f32 %v653_v30, %v652_v27 }
 0x176   :  { %v622_v19 = vpop.f32.mrf.mxu0 }
 0x177   :  { %v635_v23 = vsub.f32 %v622_v19, %v1363_v29 }
 0x178   :  { %935 = vmatpush.bf16.xpose.msrb.mxu3 %v917_v1 }
 0x179   :  { %v643_v31 = vmul.f32 %v635_v23, %v635_v23 }
 0x17b   :  { %v655_v41 = vsel %vm152_vm0, %v643_v31, 0.0 }
 0x17c   :  { %v656_v33 = vadd.f32 %v655_v41, %v654_v39 }
 0x17e   :  { %v625_v61 = vpop.f32.mrf.mxu0  ;;  %v719_v3 = vpop.f32.mrf.mxu1 }
 0x17f   :  { %v636_v36 = vsub.f32 %v625_v61, %v1368_v34  ;;  %1069 = vmatmul.msk.bf16.vlgmr.msrb.gmra.mxu3 %vm152_vm0, %v912_v8  ;;  %v739_v50 = vsub.f32 %v719_v3, %v1312_v46 }
 0x181   :  { %v644_v42 = vmul.f32 %v636_v36, %v636_v36  ;;  %v747_v13 = vmul.f32 %v739_v50, %v739_v50 }
 0x183   :  { %v657_v53 = vsel %vm152_vm0, %v644_v42, 0.0  ;;  %v755_v18 = vsel %vm152_vm0, %v747_v13, 0.0 }
 0x184   :  { %v658_v60 = vadd.f32 %v657_v53, %v656_v33 }
 0x186   :  { %v627_v56 = vpop.f32.mrf.mxu0  ;;  %v721_v54 = vpop.f32.mrf.mxu1 }
 0x187   :  { %v637_v59 = vsub.f32 %v627_v56, %v1386_v9  ;;  %v740_v48 = vsub.f32 %v721_v54, %v1315_v47 }
 0x189   :  { %v645_v62 = vmul.f32 %v637_v59, %v637_v59  ;;  %v748_v14 = vmul.f32 %v740_v48, %v740_v48 }
 0x18b   :  { %v659_v63 = vsel %vm152_vm0, %v645_v62, 0.0  ;;  %v756_v19 = vsel %vm152_vm0, %v748_v14, 0.0 }
 0x18c   :  { %v660_v0 = vadd.f32 %v659_v63, %v658_v60 }
 0x18d   :  { %v444_v17 = vpop.xlane.xlu1 %443 }
 0x18e   :  { %661 = vadd.xlane.f32.xlu2 %v660_v0  ;;  %v445_v21 = vrot.slane %v444_v17, 4 }
 0x18f   :  { %1070 = vmatmul.msk.bf16.gmra.mxu3 %vm152_vm0, %v913_v2  ;;  %v757_v2 = vadd.f32 %v756_v19, %v755_v18 }
 0x190   :  { %v446_v26 = vadd.f32 %v445_v21, %v444_v17 }
 0x192   :  { %v447_v35 = vrot.slane %v446_v26, 2 }
 0x194   :  { %v448_v44 = vadd.f32 %v447_v35, %v446_v26 }
 0x19f   :  { %1071 = vmatmul.msk.bf16.gmra.mxu3 %vm152_vm0, %v1465_v4 }
 0x1a2   :  { %s1076_s7 = spop %1075 }
 0x1a3   :  { %v234_v11 = vstv %s1076_s7 }
 0x1a4   :  { %1114 = vrsqrt.f32 %v234_v11  ;;  %vm242_vm3 = vcmp.eq.f32.partialorder %v234_v11, inf  ;;  %v245_v51 = vand.u32 2147483648, %v234_v11  ;;  %vm244_vm4 = vcmp.eq.f32.partialorder %v234_v11, 0.0 }
 0x1aa   :  { %v1115_v37 = vpop.eup %1114 }
 0x1ab   :  { %v236_v24 = vmul.f32 %v1115_v37, %v234_v11 }
 0x1ac   :  { %v553_v19 = vpop.xlane.xlu2 %552 }
 0x1ad   :  { %v237_v28 = vmul.f32 %v1115_v37, %v236_v24 }
 0x1af   :  { %v238_v32 = vmul.f32 0.5, %v237_v28  ;;  %1072 = vmatmul.msk.bf16.gmra.mxu3 %vm152_vm0, %v1459_v58 }
 0x1b1   :  { %v239_v38 = vsub.f32 1.5, %v238_v32 }
 0x1b3   :  { %v240_v43 = vmul.f32 %v1115_v37, %v239_v38 }
 0x1b5   :  { %v241_v49 = vmul.f32 %v240_v43, %v234_v11 }
 0x1b7   :  { %v243_v55 = vsel %vm242_vm3, %v234_v11, %v241_v49  ;;  %v724_v11 = vpop.f32.mrf.mxu1 }
 0x1b8   :  { %v246_v57 = vsel %vm244_vm4, %v245_v51, %v243_v55  ;;  %v741_v10 = vsub.f32 %v724_v11, %v1322_v52 }
 0x1b9   :  { %1077 = vpush %v246_v57  ;;  %v449_v57 = vrot.slane %v448_v44, 1 }
 0x1ba   :  { %1079 = vpush %v341_v40  ;;  %v749_v45 = vmul.f32 %v741_v10, %v741_v10 }
 0x1bb   :  { %v450_v3 = vadd.f32 %v449_v57, %v448_v44 }
 0x1bc   :  { %v758_v22 = vsel %vm152_vm0, %v749_v45, 0.0 }
 0x1bd   :  { %v759_v27 = vadd.f32 %v758_v22, %v757_v2  ;;  %v554_v2 = vrot.slane %v553_v19, 4 }
 0x1be   :  { %v828_v11 = vpop.f32.mrf.mxu2 }
 0x1bf   :  { %v726_v12 = vpop.f32.mrf.mxu1  ;;  %v848_v13 = vsub.f32 %v828_v11, %v1312_v46 }
 0x1c0   :  { %v742_v20 = vsub.f32 %v726_v12, %v1335_v5 }
 0x1c1   :  { %v856_v10 = vmul.f32 %v848_v13, %v848_v13 }
 0x1c2   :  { %v750_v23 = vmul.f32 %v742_v20, %v742_v20 }
 0x1c3   :  { %v864_v58 = vsel %vm152_vm0, %v856_v10, 0.0 }
 0x1c4   :  { %v760_v30 = vsel %vm152_vm0, %v750_v23, 0.0 }
 0x1c5   :  { %v761_v36 = vadd.f32 %v760_v30, %v759_v27  ;;  %v555_v27 = vadd.f32 %v554_v2, %v553_v19 }
 0x1c6   :  { %v830_v12 = vpop.f32.mrf.mxu2 }
 0x1c7   :  { %v729_v16 = vpop.f32.mrf.mxu1  ;;  %v849_v14 = vsub.f32 %v830_v12, %v1315_v47 }
 0x1c8   :  { %v743_v24 = vsub.f32 %v729_v16, %v1350_v15 }
 0x1c9   :  { %v857_v16 = vmul.f32 %v849_v14, %v849_v14 }
 0x1ca   :  { %v751_v31 = vmul.f32 %v743_v24, %v743_v24 }
 0x1cb   :  { %v865_v45 = vsel %vm152_vm0, %v857_v16, 0.0 }
 0x1cc   :  { %v762_v39 = vsel %vm152_vm0, %v751_v31, 0.0  ;;  %v866_v22 = vadd.f32 %v865_v45, %v864_v58 }
 0x1cd   :  { %v763_v51 = vadd.f32 %v762_v39, %v761_v36  ;;  %v556_v36 = vrot.slane %v555_v27, 2 }
 0x1ce   :  { %v833_v50 = vpop.f32.mrf.mxu2 }
 0x1cf   :  { %v731_v25 = vpop.f32.mrf.mxu1  ;;  %v850_v17 = vsub.f32 %v833_v50, %v1322_v52 }
 0x1d0   :  { %v744_v32 = vsub.f32 %v731_v25, %v1363_v29 }
 0x1d1   :  { %v858_v20 = vmul.f32 %v850_v17, %v850_v17 }
 0x1d2   :  { %v752_v41 = vmul.f32 %v744_v32, %v744_v32 }
 0x1d3   :  { %v867_v23 = vsel %vm152_vm0, %v858_v20, 0.0 }
 0x1d4   :  { %v764_v53 = vsel %vm152_vm0, %v752_v41, 0.0 }
 0x1d5   :  { %v765_v59 = vadd.f32 %v764_v53, %v763_v51 }
 0x1d6   :  { %v835_v48 = vpop.f32.mrf.mxu2 }
 0x1d7   :  { %v734_v43 = vpop.f32.mrf.mxu1 }
 0x1d8   :  { %v745_v49 = vsub.f32 %v734_v43, %v1368_v34 }
 0x1da   :  { %v753_v55 = vmul.f32 %v745_v49, %v745_v49  ;;  %v557_v49 = vadd.f32 %v556_v36, %v555_v27 }
 0x1dc   :  { %v766_v60 = vsel %vm152_vm0, %v753_v55, 0.0 }
 0x1dd   :  { %v767_v7 = vadd.f32 %v766_v60, %v765_v59 }
 0x1de   :  { %v838_v18 = vpop.f32.mrf.mxu2 }
 0x1df   :  { %v736_v63 = vpop.f32.mrf.mxu1  ;;  %v852_v25 = vsub.f32 %v838_v18, %v1350_v15 }
 0x1e0   :  { %v746_v6 = vsub.f32 %v736_v63, %v1386_v9 }
 0x1e1   :  { %v860_v32 = vmul.f32 %v852_v25, %v852_v25 }
 0x1e2   :  { %v754_v8 = vmul.f32 %v746_v6, %v746_v6 }
 0x1e3   :  { %v871_v41 = vsel %vm152_vm0, %v860_v32, 0.0 }
 0x1e4   :  { %v768_v1 = vsel %vm152_vm0, %v754_v8, 0.0 }
 0x1e5   :  { %v769_v54 = vadd.f32 %v768_v1, %v767_v7 }
 0x1e6   :  { %v840_v26 = vpop.f32.mrf.mxu2 }
 0x1e7   :  { %770 = vadd.xlane.f32.xlu0 %v769_v54 }
 0x1ea   :  { %s1495_s8 = spop %1077 }
 0x1eb   :  { %s1080_s9 = spop %1079 }
 0x1ec   :  { %v343_v37 = vstv %s1080_s9  ;;  %s1216_s9 = smov [#allocation9]  }
 0x1ed   :  { %1116 = vrsqrt.f32 %v343_v37  ;;  %vm351_vm5 = vcmp.eq.f32.partialorder %v343_v37, inf  ;;  %v354_v4 = vand.u32 2147483648, %v343_v37  ;;  %vm353_vm6 = vcmp.eq.f32.partialorder %v343_v37, 0.0 }
 0x1ee   :  { %v843_v44 = vpop.f32.mrf.mxu2 }
 0x1f3   :  { %v1117_v28 = vpop.eup %1116 }
 0x1f4   :  { %v345_v61 = vmul.f32 %v1117_v28, %v343_v37 }
 0x1f6   :  { %v346_v38 = vmul.f32 %v1117_v28, %v345_v61  ;;  %v853_v61 = vsub.f32 %v840_v26, %v1363_v29 }
 0x1f8   :  { %v347_v42 = vmul.f32 0.5, %v346_v38 }
 0x1fa   :  { %v348_v33 = vsub.f32 1.5, %v347_v42  ;;  %v861_v42 = vmul.f32 %v853_v61, %v853_v61 }
 0x1fc   :  { %v349_v56 = vmul.f32 %v1117_v28, %v348_v33  ;;  %v868_v28 = vadd.f32 %v867_v23, %v866_v22  ;;  %v854_v33 = vsub.f32 %v843_v44, %v1368_v34  ;;  %v873_v55 = vsel %vm152_vm0, %v861_v42, 0.0 }
 0x1fe   :  { %v350_v40 = vmul.f32 %v349_v56, %v343_v37  ;;  %v862_v56 = vmul.f32 %v854_v33, %v854_v33 }
 0x200   :  { %v352_v62 = vsel %vm351_vm5, %v343_v37, %v350_v40  ;;  %v851_v37 = vsub.f32 %v835_v48, %v1335_v5  ;;  %v558_v40 = vrot.slane %v557_v49, 1 }
 0x201   :  { %v355_v0 = vsel %vm353_vm6, %v354_v4, %v352_v62  ;;  %v875_v62 = vsel %vm152_vm0, %v862_v56, 0.0  ;;  %v662_v58 = vpop.xlane.xlu2 %661 }
 0x202   :  { %1081 = vpush %v355_v0  ;;  %v859_v24 = vmul.f32 %v851_v37, %v851_v37  ;;  %v845_v0 = vpop.f32.mrf.mxu2  ;;  %v559_v6 = vadd.f32 %v558_v40, %v557_v49  ;;  %v937_v12 = vpop.f32.mrf.mxu3 }
 0x203   :  { %1083 = vpush %v450_v3  ;;  %v855_v7 = vsub.f32 %v845_v0, %v1386_v9  ;;  %v957_v14 = vsub.f32 %v937_v12, %v1312_v46 }
 0x204   :  { %v869_v31 = vsel %vm152_vm0, %v859_v24, 0.0 }
 0x205   :  { %v870_v38 = vadd.f32 %v869_v31, %v868_v28  ;;  %v863_v1 = vmul.f32 %v855_v7, %v855_v7  ;;  %v965_v16 = vmul.f32 %v957_v14, %v957_v14 }
 0x207   :  { %v872_v53 = vadd.f32 %v871_v41, %v870_v38  ;;  %v877_v54 = vsel %vm152_vm0, %v863_v1, 0.0  ;;  %v973_v45 = vsel %vm152_vm0, %v965_v16, 0.0 }
 0x209   :  { %v874_v4 = vadd.f32 %v873_v55, %v872_v53 }
 0x20a   :  { %v939_v50 = vpop.f32.mrf.mxu3 }
 0x20b   :  { %v876_v8 = vadd.f32 %v875_v62, %v874_v4  ;;  %v958_v10 = vsub.f32 %v939_v50, %v1315_v47  ;;  %v663_v47 = vrot.slane %v662_v58, 4 }
 0x20d   :  { %v878_v11 = vadd.f32 %v877_v54, %v876_v8  ;;  %v966_v17 = vmul.f32 %v958_v10, %v958_v10  ;;  %v664_v25 = vadd.f32 %v663_v47, %v662_v58 }
 0x20f   :  { %879 = vadd.xlane.f32.xlu1 %v878_v11  ;;  %v974_v20 = vsel %vm152_vm0, %v966_v17, 0.0 }
 0x210   :  { %v975_v2 = vadd.f32 %v974_v20, %v973_v45 }
 0x212   :  { %v942_v48 = vpop.f32.mrf.mxu3 }
 0x213   :  { %v959_v18 = vsub.f32 %v942_v48, %v1322_v52 }
 0x215   :  { %v967_v37 = vmul.f32 %v959_v18, %v959_v18 }
 0x217   :  { %v976_v52 = vsel %vm152_vm0, %v967_v37, 0.0 }
 0x218   :  { %v977_v26 = vadd.f32 %v976_v52, %v975_v2 }
 0x21a   :  { %v944_v13 = vpop.f32.mrf.mxu3 }
 0x21b   :  { %v960_v46 = vsub.f32 %v944_v13, %v1335_v5  ;;  %v665_v5 = vrot.slane %v664_v25, 2 }
 0x21d   :  { %v968_v22 = vmul.f32 %v960_v46, %v960_v46  ;;  %v666_v42 = vadd.f32 %v665_v5, %v664_v25 }
 0x21f   :  { %v978_v28 = vsel %vm152_vm0, %v968_v22, 0.0  ;;  %v667_v53 = vrot.slane %v666_v42, 1 }
 0x220   :  { %v979_v61 = vadd.f32 %v978_v28, %v977_v26 }
 0x222   :  { %v947_v19 = vpop.f32.mrf.mxu3 }
 0x223   :  { %v961_v23 = vsub.f32 %v947_v19, %v1350_v15 }
 0x22a   :  { %v949_v24 = vpop.f32.mrf.mxu3 }
 0x22b   :  { %v962_v31 = vsub.f32 %v949_v24, %v1363_v29 }
 0x22d   :  { %v970_v38 = vmul.f32 %v962_v31, %v962_v31 }
 0x22f   :  { %v982_v49 = vsel %vm152_vm0, %v970_v38, 0.0 }
 0x232   :  { %v952_v41 = vpop.f32.mrf.mxu3 }
 0x233   :  { %s1517_s10 = spop %1081  ;;  %v963_v15 = vsub.f32 %v952_v41, %v1368_v34 }
 0x234   :  { %s1084_s11 = spop %1083  ;;  %s357_s12 = sadd.f32 %s1517_s10, %s1495_s8 }
 0x235   :  { %v452_v21 = vstv %s1084_s11  ;;  %v971_v33 = vmul.f32 %v963_v15, %v963_v15 }
 0x236   :  { %1118 = vrsqrt.f32 %v452_v21  ;;  %vm460_vm7 = vcmp.eq.f32.partialorder %v452_v21, inf  ;;  %v463_v60 = vand.u32 2147483648, %v452_v21  ;;  %vm462_vm8 = vcmp.eq.f32.partialorder %v452_v21, 0.0 }
 0x23c   :  { %v1119_v30 = vpop.eup %1118 }
 0x23d   :  { %v454_v35 = vmul.f32 %v1119_v30, %v452_v21 }
 0x23f   :  { %v455_v39 = vmul.f32 %v1119_v30, %v454_v35 }
 0x241   :  { %v456_v43 = vmul.f32 0.5, %v455_v39 }
 0x243   :  { %v457_v51 = vsub.f32 1.5, %v456_v43 }
 0x245   :  { %v458_v57 = vmul.f32 %v1119_v30, %v457_v51  ;;  %v969_v30 = vmul.f32 %v961_v23, %v961_v23 }
 0x247   :  { %v459_v59 = vmul.f32 %v458_v57, %v452_v21  ;;  %v980_v36 = vsel %vm152_vm0, %v969_v30, 0.0  ;;  %v984_v57 = vsel %vm152_vm0, %v971_v33, 0.0 }
 0x248   :  { %v981_v44 = vadd.f32 %v980_v36, %v979_v61 }
 0x249   :  { %v461_v63 = vsel %vm460_vm7, %v452_v21, %v459_v59  ;;  %v954_v59 = vpop.f32.mrf.mxu3 }
 0x24a   :  { %v464_v3 = vsel %vm462_vm8, %v463_v60, %v461_v63  ;;  %v983_v55 = vadd.f32 %v982_v49, %v981_v44  ;;  %v668_v60 = vadd.f32 %v667_v53, %v666_v42  ;;  %v964_v34 = vsub.f32 %v954_v59, %v1386_v9 }
 0x24b   :  { %1085 = vpush %v464_v3 }
 0x24c   :  { %1087 = vpush %v559_v6  ;;  %v985_v62 = vadd.f32 %v984_v57, %v983_v55  ;;  %v972_v63 = vmul.f32 %v964_v34, %v964_v34 }
 0x24e   :  { %v986_v0 = vsel %vm152_vm0, %v972_v63, 0.0 }
 0x24f   :  { %v987_v3 = vadd.f32 %v986_v0, %v985_v62 }
 0x251   :  { %988 = vadd.xlane.f32.xlu2 %v987_v3 }
 0x25a   :  { %v771_v6 = vpop.xlane.xlu0 %770 }
 0x25b   :  { %v772_v8 = vrot.slane %v771_v6, 4 }
 0x25d   :  { %v773_v1 = vadd.f32 %v772_v8, %v771_v6 }
 0x25f   :  { %v774_v12 = vrot.slane %v773_v1, 2 }
 0x261   :  { %v775_v48 = vadd.f32 %v774_v12, %v773_v1 }
 0x263   :  { %v776_v10 = vrot.slane %v775_v48, 1 }
 0x265   :  { %v777_v58 = vadd.f32 %v776_v10, %v775_v48 }
 0x27c   :  { %s1086_s13 = spop %1085 }
 0x27d   :  { %s1538_s14 = sadd.f32 %s1086_s13, %s357_s12  ;;  %s1088_s15 = spop %1087 }
 0x27e   :  { %v561_v21 = vstv %s1088_s15 }
 0x27f   :  { %1120 = vrsqrt.f32 %v561_v21  ;;  %vm569_vm9 = vcmp.eq.f32.partialorder %v561_v21, inf  ;;  %v572_v56 = vand.u32 2147483648, %v561_v21  ;;  %vm571_vm10 = vcmp.eq.f32.partialorder %v561_v21, 0.0 }
 0x282   :  { %v880_v45 = vpop.xlane.xlu1 %879 }
 0x283   :  { %v881_v37 = vrot.slane %v880_v45, 4 }
 0x285   :  { %v1121_v27 = vpop.eup %1120  ;;  %v882_v46 = vadd.f32 %v881_v37, %v880_v45 }
 0x286   :  { %v563_v32 = vmul.f32 %v1121_v27, %v561_v21 }
 0x287   :  { %v883_v2 = vrot.slane %v882_v46, 2 }
 0x288   :  { %v564_v35 = vmul.f32 %v1121_v27, %v563_v32 }
 0x289   :  { %v884_v23 = vadd.f32 %v883_v2, %v882_v46 }
 0x28a   :  { %v565_v39 = vmul.f32 0.5, %v564_v35 }
 0x28b   :  { %v885_v26 = vrot.slane %v884_v23, 1 }
 0x28c   :  { %v566_v43 = vsub.f32 1.5, %v565_v39 }
 0x28d   :  { %v886_v32 = vadd.f32 %v885_v26, %v884_v23 }
 0x28e   :  { %v567_v51 = vmul.f32 %v1121_v27, %v566_v43 }
 0x290   :  { %v568_v29 = vmul.f32 %v567_v51, %v561_v21 }
 0x292   :  { %v570_v40 = vsel %vm569_vm9, %v561_v21, %v568_v29 }
 0x293   :  { %v573_v4 = vsel %vm571_vm10, %v572_v56, %v570_v40 }
 0x294   :  { %1089 = vpush %v573_v4 }
 0x295   :  { %1091 = vpush %v668_v60 }
 0x2c4   :  { %v989_v5 = vpop.xlane.xlu2 %988 }
 0x2c5   :  { %s1090_s16 = spop %1089  ;;  %v990_v35 = vrot.slane %v989_v5, 4 }
 0x2c6   :  { %s575_s17 = sadd.f32 %s1090_s16, %s1538_s14  ;;  %s1092_s18 = spop %1091 }
 0x2c7   :  { %v670_v7 = vstv %s1092_s18  ;;  %v991_v36 = vadd.f32 %v990_v35, %v989_v5 }
 0x2c8   :  { %1122 = vrsqrt.f32 %v670_v7  ;;  %vm678_vm0 = vcmp.eq.f32.partialorder %v670_v7, inf  ;;  %v681_v17 = vand.u32 2147483648, %v670_v7  ;;  %vm680_vm11 = vcmp.eq.f32.partialorder %v670_v7, 0.0 }
 0x2c9   :  { %v992_v41 = vrot.slane %v991_v36, 2 }
 0x2cb   :  { %v993_v43 = vadd.f32 %v992_v41, %v991_v36 }
 0x2cd   :  { %v994_v33 = vrot.slane %v993_v43, 1 }
 0x2ce   :  { %v1123_v54 = vpop.eup %1122 }
 0x2cf   :  { %v672_v11 = vmul.f32 %v1123_v54, %v670_v7  ;;  %v995_v56 = vadd.f32 %v994_v33, %v993_v43 }
 0x2d1   :  { %v673_v9 = vmul.f32 %v1123_v54, %v672_v11 }
 0x2d3   :  { %v674_v50 = vmul.f32 0.5, %v673_v9 }
 0x2d5   :  { %v675_v13 = vsub.f32 1.5, %v674_v50 }
 0x2d7   :  { %v676_v14 = vmul.f32 %v1123_v54, %v675_v13 }
 0x2d9   :  { %v677_v16 = vmul.f32 %v676_v14, %v670_v7 }
 0x2db   :  { %v679_v18 = vsel %vm678_vm0, %v670_v7, %v677_v16 }
 0x2dc   :  { %v682_v19 = vsel %vm680_vm11, %v681_v17, %v679_v18 }
 0x2dd   :  { %1093 = vpush %v682_v19 }
 0x2de   :  { %1095 = vpush %v777_v58 }
 0x30e   :  { %s1094_s19 = spop %1093 }
 0x30f   :  { %s1553_s20 = sadd.f32 %s1094_s19, %s575_s17  ;;  %s1096_s21 = spop %1095 }
 0x310   :  { %v779_v20 = vstv %s1096_s21 }
 0x311   :  { %1124 = vrsqrt.f32 %v779_v20  ;;  %vm787_vm12 = vcmp.eq.f32.partialorder %v779_v20, inf  ;;  %v790_v28 = vand.u32 2147483648, %v779_v20  ;;  %vm789_vm13 = vcmp.eq.f32.partialorder %v779_v20, 0.0 }
 0x317   :  { %v1125_v21 = vpop.eup %1124 }
 0x318   :  { %v781_v47 = vmul.f32 %v1125_v21, %v779_v20 }
 0x31a   :  { %v782_v52 = vmul.f32 %v1125_v21, %v781_v47 }
 0x31c   :  { %v783_v22 = vmul.f32 0.5, %v782_v52 }
 0x31e   :  { %v784_v24 = vsub.f32 1.5, %v783_v22 }
 0x320   :  { %v785_v25 = vmul.f32 %v1125_v21, %v784_v24 }
 0x322   :  { %v786_v27 = vmul.f32 %v785_v25, %v779_v20 }
 0x324   :  { %v788_v30 = vsel %vm787_vm12, %v779_v20, %v786_v27 }
 0x325   :  { %v791_v31 = vsel %vm789_vm13, %v790_v28, %v788_v30 }
 0x326   :  { %1097 = vpush %v791_v31 }
 0x327   :  { %1099 = vpush %v886_v32 }
 0x357   :  { %s1098_s22 = spop %1097 }
 0x358   :  { %s793_s0 = sadd.f32 %s1098_s22, %s1553_s20  ;;  %s1100_s23 = spop %1099 }
 0x359   :  { %v888_v61 = vstv %s1100_s23 }
 0x35a   :  { %1126 = vrsqrt.f32 %v888_v61  ;;  %vm896_vm14 = vcmp.eq.f32.partialorder %v888_v61, inf  ;;  %v899_v53 = vand.u32 2147483648, %v888_v61  ;;  %vm898_vm15 = vcmp.eq.f32.partialorder %v888_v61, 0.0 }
 0x360   :  { %v1127_v38 = vpop.eup %1126 }
 0x361   :  { %v890_v39 = vmul.f32 %v1127_v38, %v888_v61 }
 0x363   :  { %v891_v42 = vmul.f32 %v1127_v38, %v890_v39 }
 0x365   :  { %v892_v15 = vmul.f32 0.5, %v891_v42 }
 0x367   :  { %v893_v44 = vsub.f32 1.5, %v892_v15 }
 0x369   :  { %v894_v49 = vmul.f32 %v1127_v38, %v893_v44 }
 0x36b   :  { %v895_v51 = vmul.f32 %v894_v49, %v888_v61 }
 0x36d   :  { %v897_v29 = vsel %vm896_vm14, %v888_v61, %v895_v51 }
 0x36e   :  { %v900_v55 = vsel %vm898_vm15, %v899_v53, %v897_v29 }
 0x36f   :  { %1101 = vpush %v900_v55 }
 0x370   :  { %1103 = vpush %v995_v56 }
 0x3a0   :  { %s1102_s24 = spop %1101 }
 0x3a1   :  { %s902_s25 = sadd.f32 %s1102_s24, %s793_s0  ;;  %s1104_s26 = spop %1103 }
 0x3a2   :  { %v997_v57 = vstv %s1104_s26 }
 0x3a3   :  { %1128 = vrsqrt.f32 %v997_v57  ;;  %vm1005_vm1 = vcmp.eq.f32.partialorder %v997_v57, inf  ;;  %v1008_v0 = vand.u32 2147483648, %v997_v57  ;;  %vm1007_vm2 = vcmp.eq.f32.partialorder %v997_v57, 0.0 }
 0x3a9   :  { %v1129_v40 = vpop.eup %1128 }
 0x3aa   :  { %v999_v59 = vmul.f32 %v1129_v40, %v997_v57 }
 0x3ac   :  { %v1000_v4 = vmul.f32 %v1129_v40, %v999_v59 }
 0x3ae   :  { %v1001_v60 = vmul.f32 0.5, %v1000_v4 }
 0x3b0   :  { %v1002_v34 = vsub.f32 1.5, %v1001_v60 }
 0x3b2   :  { %v1003_v62 = vmul.f32 %v1129_v40, %v1002_v34 }
 0x3b4   :  { %v1004_v63 = vmul.f32 %v1003_v62, %v997_v57 }
 0x3b6   :  { %v1006_v3 = vsel %vm1005_vm1, %v997_v57, %v1004_v63 }
 0x3b7   :  { %v1009_v6 = vsel %vm1007_vm2, %v1008_v0, %v1006_v3 }
 0x3b8   :  { %1105 = vpush %v1009_v6 }
 0x3e9   :  { %s1106_s2 = spop %1105 }
 0x3ea   :  { %s1011_s27 = sadd.f32 %s1106_s2, %s902_s25 }
 0x3ec   :  { %s1012_s28 = smul.f32 0.125, %s1011_s27 }
 0x3ee   :  { %s1013_s7 = smul.f32 0.001, %s1012_s28 }
 0x3f0   :  { %s1014_s8 = sadd.f32 %s1013_s7, %s114_s5 }
 0x3f2   :  { %1016 = sst [smem:[#allocation9]] %s1014_s8 }
 0x3f3   :  { %1025 = dma.smem_to_hbm %s1216_s9, 16, %s1023_s4, [#allocation6]  }
 0x3f4   :  { %1208 = dma.done.wait [#allocation6], 16  }
 0x3f5   :  { %1209 = vsyncadd [#allocation6], 4294967280 }
 0x3f6   :  { %1030 = sfence }
 0x3f7   :  { %1031 = vsyncpa [#allocation5], 1 }
 0x3f8   :  { %1032 = vsyncpa [#allocation8], 1 }
 0x3f9   :  { %1033 = vsyncpa [#allocation6], 1 }

</bundles_post_ra>
